<compile_context>
chip_gen: v7x
topology: tpu7x:2x2x1
jax: 0.10.0
libtpu: 0.0.40
codegen_flags: <defaults>
</compile_context>

<pallas_src>
import functools

import jax
import jax.numpy as jnp
from jax.experimental import pallas as pl
from jax.experimental.pallas import tpu as pltpu


# ----------------------------------------------------------------------------
# Pallas kernels
# ----------------------------------------------------------------------------
def _conv_leaky_kernel(p_ref, w_ref, o_ref):
    """One M-tile of LeakyReLU_0.2(patches @ W).  No dead scale/bias path."""
    acc = jnp.dot(p_ref[...], w_ref[...], preferred_element_type=jnp.float32)
    o_ref[...] = jnp.where(acc >= 0.0, acc, 0.2 * acc)


def _conv_bn_leaky_kernel(p_ref, w_ref, g_ref, b_ref, o_ref, acc_ref, *, eps):
    """Fused Conv2d(bias=False) + BatchNorm2d(batch stats) + LeakyReLU(0.2).

    Single grid step: the whole [M, Cout] conv result lives in VMEM scratch,
    so the per-channel moments and the normalize+activation are applied with
    no intermediate HBM traffic.
    """
    acc_ref[...] = jnp.dot(p_ref[...], w_ref[...],
                           preferred_element_type=jnp.float32)
    acc = acc_ref[...]
    mean = jnp.mean(acc, axis=0, keepdims=True)                  # [1, Cout]
    ctr = acc - mean
    var = jnp.mean(ctr * ctr, axis=0, keepdims=True)             # biased var
    inv_std = jax.lax.rsqrt(var + eps)
    scale = g_ref[...] * inv_std
    bias = b_ref[...] - mean * scale
    y = acc * scale + bias
    o_ref[...] = jnp.where(y >= 0.0, y, 0.2 * y)


def _conv_bn_leaky_head_kernel(p_ref, w_ref, g_ref, b_ref, w5_ref, o_ref,
                               acc_ref, *, eps, n_batch, spatial):
    """Layer 4 (conv+BN+LeakyReLU) fused with layer 5 (4x4 valid conv+sigmoid).

    The final conv reduces each batch element's entire 4x4 x Cout activation
    to a single logit, so it is computed here as an elementwise multiply +
    reduction, avoiding another pallas_call and an HBM round trip.
    """
    acc_ref[...] = jnp.dot(p_ref[...], w_ref[...],
                           preferred_element_type=jnp.float32)
    acc = acc_ref[...]
    mean = jnp.mean(acc, axis=0, keepdims=True)
    ctr = acc - mean
    var = jnp.mean(ctr * ctr, axis=0, keepdims=True)
    inv_std = jax.lax.rsqrt(var + eps)
    scale = g_ref[...] * inv_std
    bias = b_ref[...] - mean * scale
    y = acc * scale + bias
    z = jnp.where(y >= 0.0, y, 0.2 * y)                          # [N*S, C]
    c = z.shape[-1]
    z3 = z.reshape(n_batch, spatial, c)                          # [N, S, C]
    prod = z3 * w5_ref[...]                                      # bcast [S, C]
    per_pos = jnp.sum(prod, axis=-1)                             # [N, S]
    logit = jnp.sum(per_pos, axis=-1, keepdims=True)             # [N, 1]
    o_ref[...] = 1.0 / (1.0 + jnp.exp(-logit))


# ----------------------------------------------------------------------------
# Pallas wrappers
# ----------------------------------------------------------------------------
def conv_leaky(patches, w_mat, *, m_tiles=2):
    """LeakyReLU(patches @ w_mat), M split over `m_tiles` parallel grid steps."""
    M, K = patches.shape
    Cout = w_mat.shape[1]
    if m_tiles < 1 or M % (8 * m_tiles) != 0:
        m_tiles = 1
    tm = M // m_tiles
    return pl.pallas_call(
        _conv_leaky_kernel,
        out_shape=jax.ShapeDtypeStruct((M, Cout), jnp.float32),
        grid=(m_tiles,),
        in_specs=[
            pl.BlockSpec((tm, K), lambda i: (i, 0)),
            pl.BlockSpec((K, Cout), lambda i: (0, 0)),
        ],
        out_specs=pl.BlockSpec((tm, Cout), lambda i: (i, 0)),
        compiler_params=pltpu.CompilerParams(
            dimension_semantics=("parallel",)),
    )(patches, w_mat)


def conv_bn_leaky(patches, w_mat, gamma, beta, eps=1e-5):
    """Fused conv + BN(training stats) + LeakyReLU in one single-step call."""
    M, K = patches.shape
    Cout = w_mat.shape[1]
    return pl.pallas_call(
        functools.partial(_conv_bn_leaky_kernel, eps=eps),
        out_shape=jax.ShapeDtypeStruct((M, Cout), jnp.float32),
        grid=(1,),
        in_specs=[
            pl.BlockSpec((M, K), lambda i: (0, 0)),
            pl.BlockSpec((K, Cout), lambda i: (0, 0)),
            pl.BlockSpec((1, Cout), lambda i: (0, 0)),
            pl.BlockSpec((1, Cout), lambda i: (0, 0)),
        ],
        out_specs=pl.BlockSpec((M, Cout), lambda i: (0, 0)),
        scratch_shapes=[pltpu.VMEM((M, Cout), jnp.float32)],
        compiler_params=pltpu.CompilerParams(
            dimension_semantics=("arbitrary",)),
    )(patches, w_mat, gamma.reshape(1, -1), beta.reshape(1, -1))


def conv_bn_leaky_head(patches, w_mat, gamma, beta, w5_mat, n_batch, spatial,
                       eps=1e-5):
    """Layer-4 fused kernel that also produces the final sigmoid output [N,1]."""
    M, K = patches.shape
    Cout = w_mat.shape[1]
    return pl.pallas_call(
        functools.partial(_conv_bn_leaky_head_kernel, eps=eps,
                          n_batch=n_batch, spatial=spatial),
        out_shape=jax.ShapeDtypeStruct((n_batch, 1), jnp.float32),
        grid=(1,),
        in_specs=[
            pl.BlockSpec((M, K), lambda i: (0, 0)),
            pl.BlockSpec((K, Cout), lambda i: (0, 0)),
            pl.BlockSpec((1, Cout), lambda i: (0, 0)),
            pl.BlockSpec((1, Cout), lambda i: (0, 0)),
            pl.BlockSpec((spatial, Cout), lambda i: (0, 0)),
        ],
        out_specs=pl.BlockSpec((n_batch, 1), lambda i: (0, 0)),
        scratch_shapes=[pltpu.VMEM((M, Cout), jnp.float32)],
        compiler_params=pltpu.CompilerParams(
            dimension_semantics=("arbitrary",)),
    )(patches, w_mat, gamma.reshape(1, -1), beta.reshape(1, -1), w5_mat)


# ----------------------------------------------------------------------------
# Glue: NHWC im2col + weight packing (no inter-layer transposes)
# ----------------------------------------------------------------------------
def im2col_nhwc(x, ksize, stride, pad):
    """x: [N, H, W, C] -> patches [N*Ho*Wo, ksize*ksize*C], column order (kh, kw, c)."""
    N, H, W, C = x.shape
    xp = jnp.pad(x, ((0, 0), (pad, pad), (pad, pad), (0, 0)))
    Ho = (H + 2 * pad - ksize) // stride + 1
    Wo = (W + 2 * pad - ksize) // stride + 1
    cols = []
    for kh in range(ksize):
        for kw in range(ksize):
            cols.append(xp[:, kh:kh + Ho * stride:stride,
                           kw:kw + Wo * stride:stride, :])
    p = jnp.stack(cols, axis=3)                     # [N, Ho, Wo, kk, C]
    return p.reshape(N * Ho * Wo, ksize * ksize * C), Ho, Wo


def _w_to_mat(w):
    """OIHW [Cout, Cin, kh, kw] -> [kh*kw*Cin, Cout] matching im2col_nhwc columns."""
    cout = w.shape[0]
    return w.transpose(2, 3, 1, 0).reshape(-1, cout)


def discriminator_forward(x, params, eps=1e-5):
    """Equivalent of Discriminator.forward; x is NCHW, spatial must be 64."""
    N = x.shape[0]
    h = jnp.transpose(x, (0, 2, 3, 1))                   # single NCHW->NHWC transpose

    # layer 1: conv + LeakyReLU (2 parallel M-tiles for v7x megacore)
    p, Ho, Wo = im2col_nhwc(h, 4, 2, 1)
    y = conv_leaky(p, _w_to_mat(params["w1"]), m_tiles=2)
    h = y.reshape(N, Ho, Wo, -1)                         # row-major reshape only

    # layers 2-3: fused conv + BN + LeakyReLU, one pallas_call each
    for wk, gk, bk in (("w2", "g2", "b2"), ("w3", "g3", "b3")):
        p, Ho, Wo = im2col_nhwc(h, 4, 2, 1)
        y = conv_bn_leaky(p, _w_to_mat(params[wk]), params[gk], params[bk], eps)
        h = y.reshape(N, Ho, Wo, -1)

    # layer 4 fused with layer 5 (4x4 valid conv + sigmoid) in one kernel
    p, Ho, Wo = im2col_nhwc(h, 4, 2, 1)                  # Ho = Wo = 4
    spatial = Ho * Wo
    w5_mat = params["w5"][0].transpose(1, 2, 0).reshape(spatial, -1)  # [S, C4]
    out = conv_bn_leaky_head(p, _w_to_mat(params["w4"]), params["g4"],
                             params["b4"], w5_mat, N, spatial, eps)
    return out.reshape(-1)                               # [N], == view(-1,1).squeeze(1)


# ----------------------------------------------------------------------------
# Pure-JAX reference (for correctness check)
# ----------------------------------------------------------------------------
def reference_forward(x, params, eps=1e-5):
    def conv(h, w, stride, pad):
        return jax.lax.conv_general_dilated(
            h, w, (stride, stride), [(pad, pad), (pad, pad)],
            dimension_numbers=("NCHW", "OIHW", "NCHW"))

    def bn(h, g, b):
        mean = jnp.mean(h, axis=(0, 2, 3), keepdims=True)
        var = jnp.mean((h - mean) ** 2, axis=(0, 2, 3), keepdims=True)
        return (h - mean) * jax.lax.rsqrt(var + eps) * g.reshape(1, -1, 1, 1) \
            + b.reshape(1, -1, 1, 1)

    def leaky(h):
        return jnp.where(h >= 0, h, 0.2 * h)

    h = leaky(conv(x, params["w1"], 2, 1))
    h = leaky(bn(conv(h, params["w2"], 2, 1), params["g2"], params["b2"]))
    h = leaky(bn(conv(h, params["w3"], 2, 1), params["g3"], params["b3"]))
    h = leaky(bn(conv(h, params["w4"], 2, 1), params["g4"], params["b4"]))
    h = jax.nn.sigmoid(conv(h, params["w5"], 1, 0))
    return h.reshape(-1, 1).squeeze(1)


# ----------------------------------------------------------------------------
# Main
# ----------------------------------------------------------------------------
if __name__ == "__main__":
    # Small config: batch=2, image_channels=1, hidden_dim=32.
    # The architecture (4 stride-2 convs + final 4x4 valid conv) requires 64x64 input.
    N, C_IMG, HID, HW = 2, 1, 32, 64

    key = jax.random.PRNGKey(0)
    ks = jax.random.split(key, 10)

    def conv_w(k, cout, cin):
        return (0.05 * jax.random.normal(k, (cout, cin, 4, 4))).astype(jnp.float32)

    params = {
        "w1": conv_w(ks[0], HID, C_IMG),
        "w2": conv_w(ks[1], HID * 2, HID),
        "g2": (1.0 + 0.1 * jax.random.normal(ks[2], (HID * 2,))).astype(jnp.float32),
        "b2": (0.05 * jax.random.normal(ks[3], (HID * 2,))).astype(jnp.float32),
        "w3": conv_w(ks[4], HID * 4, HID * 2),
        "g3": (1.0 + 0.1 * jax.random.normal(ks[5], (HID * 4,))).astype(jnp.float32),
        "b3": (0.05 * jax.random.normal(ks[5], (HID * 4,))).astype(jnp.float32),
        "w4": conv_w(ks[6], HID * 8, HID * 4),
        "g4": (1.0 + 0.1 * jax.random.normal(ks[7], (HID * 8,))).astype(jnp.float32),
        "b4": (0.05 * jax.random.normal(ks[7], (HID * 8,))).astype(jnp.float32),
        "w5": conv_w(ks[8], 1, HID * 8),
    }

    x = jax.random.normal(ks[9], (N, C_IMG, HW, HW), dtype=jnp.float32)

    out = discriminator_forward(x, params)
    out = jax.block_until_ready(out)

    ref = jax.block_until_ready(reference_forward(x, params))
    assert out.shape == (N,), f"bad output shape {out.shape}"
    max_err = float(jnp.max(jnp.abs(out - ref)))
    assert max_err < 2e-2, f"mismatch vs reference: {max_err}"

    print("KERNEL_OK")
</pallas_src>

<mosaic_0001>
module attributes {stable_mosaic.version = 11 : i64} {
  func.func @_conv_leaky_kernel(%arg0: i32, %arg1: memref<1024x16xf32, #tpu.memory_space<vmem>>, %arg2: memref<16x32xf32, #tpu.memory_space<vmem>>, %arg3: memref<1024x32xf32, #tpu.memory_space<vmem>>) attributes {dimension_semantics = [#tpu.dimension_semantics<parallel>], iteration_bounds = array<i64: 2>, scalar_prefetch = 0 : i64, scratch_operands = 0 : i64, tpu.core_type = #tpu.core_type<tc>, window_params = [{transform_indices = @transform_0, window_bounds = array<i64: 1024, 16>}, {pipeline_mode = #tpu.pipeline_mode<synchronous>, transform_indices = @transform_1, window_bounds = array<i64: 16, 32>}, {transform_indices = @transform_2, window_bounds = array<i64: 1024, 32>}]} {
    %c0 = arith.constant 0 : index
    %c0_0 = arith.constant 0 : index
    %0 = vector.load %arg1[%c0, %c0_0] : memref<1024x16xf32, #tpu.memory_space<vmem>>, vector<1024x16xf32>
    %c0_1 = arith.constant 0 : index
    %c0_2 = arith.constant 0 : index
    %1 = vector.load %arg2[%c0_1, %c0_2] : memref<16x32xf32, #tpu.memory_space<vmem>>, vector<16x32xf32>
    %cst = arith.constant dense<0.000000e+00> : vector<1024x32xf32>
    %2 = tpu.matmul %0, %1, %cst {dimension_numbers = #tpu.dot_dimension_numbers<[1], [0], [0], [1], [0, 0, 1, 1], [], []>} : vector<1024x16xf32>, vector<16x32xf32>, vector<1024x32xf32> -> vector<1024x32xf32>
    %cst_3 = arith.constant 0.000000e+00 : f32
    %3 = vector.broadcast %cst_3 : f32 to vector<1024x32xf32>
    %4 = arith.cmpf oge, %2, %3 : vector<1024x32xf32>
    %cst_4 = arith.constant 2.000000e-01 : f32
    %5 = vector.broadcast %cst_4 : f32 to vector<1024x32xf32>
    %6 = arith.mulf %5, %2 : vector<1024x32xf32>
    %7 = arith.select %4, %2, %6 : vector<1024x32xi1>, vector<1024x32xf32>
    %c0_5 = arith.constant 0 : index
    %c0_6 = arith.constant 0 : index
    %8 = vector.load %arg3[%c0_5, %c0_6] : memref<1024x32xf32, #tpu.memory_space<vmem>>, vector<1024x32xf32>
    tpu.vector_store %arg3[%c0_5, %c0_6], %7 {strides = array<i32>} : memref<1024x32xf32, #tpu.memory_space<vmem>>, vector<1024x32xf32>,
    return
  }
  func.func @transform_0(%arg0: i32) -> (i32, i32) {
    %c0_i32 = arith.constant 0 : i32
    %c0_i32_0 = arith.constant 0 : i32
    return %arg0, %c0_i32 : i32, i32
  }
  func.func @transform_1(%arg0: i32) -> (i32, i32) {
    %c0_i32 = arith.constant 0 : i32
    %c0_i32_0 = arith.constant 0 : i32
    %c0_i32_1 = arith.constant 0 : i32
    return %c0_i32, %c0_i32_0 : i32, i32
  }
  func.func @transform_2(%arg0: i32) -> (i32, i32) {
    %c0_i32 = arith.constant 0 : i32
    %c0_i32_0 = arith.constant 0 : i32
    return %arg0, %c0_i32 : i32, i32
  }
}

</mosaic_0001>

<bundles_post_ra>
// kernel: tpu_custom_call.1
= control target key start
LH: loop header
LB: loop body
LE: loop exit
PB: predicated region body
PF: predicated region fallthrough
CT: control target
= control target key end

     0   :  { %s2438_s9 = smov 0   ;;  %s2984_s0 = inlined_call_operand.vmem [shape: f32[2048,16], index: 0, kind: input, shape index: {}]   ;;  %s2985_s1 = inlined_call_operand.vmem [shape: f32[16,32], index: 1, kind: input, shape index: {}]   ;;  %s2986_s2 = inlined_call_operand.vmem [shape: f32[2048,32], index: 2, kind: output, shape index: {}]  }
   0x1 LB: > { %s1936_s10 = sadd.s32 4294967295, %s2421_s9   ;;  %p1940_p0 = scmp.ge.s32.totalorder %s2421_s9, 1  ;;  %s2421_s9 = sphi %s2438_s9, %s12_s9  }
   0x2   : > { %p113_p1 = scmp.lt.s32.totalorder %s2421_s9, 3 }
   0x4   : > { %p114_p2 = pnand %p1940_p0, %p113_p1 }
   0x5   : > { %v275_v0 = vld [vmem:[%s2985_s1] sm:$0xff] (!%p114_p2)  ;;  %v276_v1 = vld [vmem:[%s2985_s1 + $0x8] sm:$0xff] (!%p114_p2)  ;;  %s1941_s15 = sshll.u32 (!%p114_p2), %s1936_s10, 7  ;;  %vm277_vm0 = vcmask (!%p114_p2), 130048   ;;  %vm1751_vm1 = vcmask (!%p114_p2), 261120  }
   0x6   : > { %117 = sbr.rel (%p114_p2) target bundleno = 360 (0x168), region = 28  ;;  %v2401_v2 = vpack.c.bf16 (!%p114_p2), %v276_v1, %v275_v0  ;;  %p136_p3 = scmp.lt.s32.totalorder (!%p114_p2), %s1941_s15, 255 }
   0x8   : > { %2402 = vmatprep.subr.bf16.mxu0 (!%p114_p2), %v2401_v2  ;;  %2405 = vmatprep.subr.bf16.mxu1 (!%p114_p2), %v2401_v2 }
   0x9   : > { %2404 = vmatpush3.bf16.msra.mxu0 (!%p114_p2), %v2401_v2  ;;  %2406 = vmatpush3.bf16.msra.mxu1 (!%p114_p2), %v2401_v2 }
   0xd   : > { %s2988_s15 = smov (!%p136_p3, %s1941_s15), 255 }
   0xe   : > { %s1942_s16 = sshll.u32 %s2988_s15, 3 }
   0xf   : > { %s2460_s19 = scalar_lea.vmem %s2984_s0, %s1942_s16  ;;  %s2723_s22 = scalar_lea.vmem %s2986_s2, %s1942_s16 }
  0x10   : > { %v147_v3 = vld [vmem:[%s2460_s19] sm:$0xff]  ;;  %v148_v5 = vld [vmem:[%s2460_s19 + $0x8] sm:$0xff]  ;;  %v149_v7 = vld [vmem:[%s2460_s19 + $0x10] sm:$0xff] }
  0x11   : > { %v211_v4 = vld [vmem:[%s2460_s19 + $0x200] sm:$0xff]  ;;  %2209 = vmatprep.mubr.msk.f32.mxu0 %vm277_vm0, %v147_v3  ;;  %v212_v6 = vld [vmem:[%s2460_s19 + $0x208] sm:$0xff]  ;;  %v213_v8 = vld [vmem:[%s2460_s19 + $0x210] sm:$0xff] }
  0x12   : > { %2305 = vmatprep.mubr.msk.f32.mxu1 %vm277_vm0, %v211_v4  ;;  %2210 = vmatmul.mubr.msk.f32.vlgmr.msra.gmra.mrb[0].mxu0 %vm277_vm0, %v148_v5  ;;  %v150_v9 = vld [vmem:[%s2460_s19 + $0x18] sm:$0xff]  ;;  %v151_v11 = vld [vmem:[%s2460_s19 + $0x20] sm:$0xff]  ;;  %v152_v13 = vld [vmem:[%s2460_s19 + $0x28] sm:$0xff] }
  0x13   : > { %2306 = vmatmul.mubr.msk.f32.vlgmr.msra.gmra.mrb[0].mxu1 %vm277_vm0, %v212_v6  ;;  %2212 = vmatprep.mubr.msk.f32.mxu0 %vm277_vm0, %v149_v7  ;;  %v214_v10 = vld [vmem:[%s2460_s19 + $0x218] sm:$0xff]  ;;  %v215_v12 = vld [vmem:[%s2460_s19 + $0x220] sm:$0xff]  ;;  %v216_v14 = vld [vmem:[%s2460_s19 + $0x228] sm:$0xff] }
  0x14   : > { %2308 = vmatprep.mubr.msk.f32.mxu1 %vm277_vm0, %v213_v8  ;;  %v153_v15 = vld [vmem:[%s2460_s19 + $0x30] sm:$0xff]  ;;  %v154_v17 = vld [vmem:[%s2460_s19 + $0x38] sm:$0xff]  ;;  %v155_v19 = vld [vmem:[%s2460_s19 + $0x40] sm:$0xff] }
  0x15   : > { %v217_v16 = vld [vmem:[%s2460_s19 + $0x230] sm:$0xff]  ;;  %v218_v18 = vld [vmem:[%s2460_s19 + $0x238] sm:$0xff]  ;;  %v219_v20 = vld [vmem:[%s2460_s19 + $0x240] sm:$0xff] }
  0x16   : > { %2213 = vmatmul.mubr.msk.f32.gmra.mrb[2].mxu0 %vm277_vm0, %v150_v9  ;;  %v156_v21 = vld [vmem:[%s2460_s19 + $0x48] sm:$0xff]  ;;  %v157_v23 = vld [vmem:[%s2460_s19 + $0x50] sm:$0xff]  ;;  %v158_v25 = vld [vmem:[%s2460_s19 + $0x58] sm:$0xff] }
  0x17   : > { %2309 = vmatmul.mubr.msk.f32.gmra.mrb[2].mxu1 %vm277_vm0, %v214_v10  ;;  %2215 = vmatprep.mubr.msk.f32.mxu0 %vm277_vm0, %v151_v11  ;;  %v220_v22 = vld [vmem:[%s2460_s19 + $0x248] sm:$0xff]  ;;  %v221_v24 = vld [vmem:[%s2460_s19 + $0x250] sm:$0xff]  ;;  %v222_v26 = vld [vmem:[%s2460_s19 + $0x258] sm:$0xff] }
  0x18   : > { %2311 = vmatprep.mubr.msk.f32.mxu1 %vm277_vm0, %v215_v12  ;;  %v159_v27 = vld [vmem:[%s2460_s19 + $0x60] sm:$0xff]  ;;  %v160_v29 = vld [vmem:[%s2460_s19 + $0x68] sm:$0xff]  ;;  %v161_v31 = vld [vmem:[%s2460_s19 + $0x70] sm:$0xff] }
  0x19   : > { %v223_v28 = vld [vmem:[%s2460_s19 + $0x260] sm:$0xff]  ;;  %v224_v30 = vld [vmem:[%s2460_s19 + $0x268] sm:$0xff]  ;;  %v225_v32 = vld [vmem:[%s2460_s19 + $0x270] sm:$0xff] }
  0x1a   : > { %2216 = vmatmul.mubr.msk.f32.gmra.mrb[4].mxu0 %vm277_vm0, %v152_v13  ;;  %v162_v33 = vld [vmem:[%s2460_s19 + $0x78] sm:$0xff]  ;;  %v163_v35 = vld [vmem:[%s2460_s19 + $0x80] sm:$0xff]  ;;  %v164_v37 = vld [vmem:[%s2460_s19 + $0x88] sm:$0xff] }
  0x1b   : > { %2312 = vmatmul.mubr.msk.f32.gmra.mrb[4].mxu1 %vm277_vm0, %v216_v14  ;;  %2218 = vmatprep.mubr.msk.f32.mxu0 %vm277_vm0, %v153_v15  ;;  %v226_v34 = vld [vmem:[%s2460_s19 + $0x278] sm:$0xff]  ;;  %v227_v36 = vld [vmem:[%s2460_s19 + $0x280] sm:$0xff]  ;;  %v228_v38 = vld [vmem:[%s2460_s19 + $0x288] sm:$0xff] }
  0x1c   : > { %2314 = vmatprep.mubr.msk.f32.mxu1 %vm277_vm0, %v217_v16  ;;  %v165_v39 = vld [vmem:[%s2460_s19 + $0x90] sm:$0xff]  ;;  %v166_v41 = vld [vmem:[%s2460_s19 + $0x98] sm:$0xff]  ;;  %v167_v43 = vld [vmem:[%s2460_s19 + $0xa0] sm:$0xff] }
  0x1d   : > { %v229_v40 = vld [vmem:[%s2460_s19 + $0x290] sm:$0xff]  ;;  %v230_v42 = vld [vmem:[%s2460_s19 + $0x298] sm:$0xff]  ;;  %v231_v44 = vld [vmem:[%s2460_s19 + $0x2a0] sm:$0xff] }
  0x1e   : > { %2219 = vmatmul.mubr.msk.f32.gmra.mrb[6].mxu0 %vm277_vm0, %v154_v17  ;;  %v168_v45 = vld [vmem:[%s2460_s19 + $0xa8] sm:$0xff]  ;;  %v169_v47 = vld [vmem:[%s2460_s19 + $0xb0] sm:$0xff]  ;;  %v170_v49 = vld [vmem:[%s2460_s19 + $0xb8] sm:$0xff] }
  0x1f   : > { %2315 = vmatmul.mubr.msk.f32.gmra.mrb[6].mxu1 %vm277_vm0, %v218_v18  ;;  %2221 = vmatprep.mubr.msk.f32.mxu0 %vm277_vm0, %v155_v19  ;;  %v232_v46 = vld [vmem:[%s2460_s19 + $0x2a8] sm:$0xff]  ;;  %v233_v48 = vld [vmem:[%s2460_s19 + $0x2b0] sm:$0xff]  ;;  %v234_v50 = vld [vmem:[%s2460_s19 + $0x2b8] sm:$0xff] }
  0x20   : > { %2317 = vmatprep.mubr.msk.f32.mxu1 %vm277_vm0, %v219_v20  ;;  %v171_v51 = vld [vmem:[%s2460_s19 + $0xc0] sm:$0xff]  ;;  %v172_v53 = vld [vmem:[%s2460_s19 + $0xc8] sm:$0xff]  ;;  %v173_v55 = vld [vmem:[%s2460_s19 + $0xd0] sm:$0xff] }
  0x21   : > { %v235_v52 = vld [vmem:[%s2460_s19 + $0x2c0] sm:$0xff]  ;;  %v236_v54 = vld [vmem:[%s2460_s19 + $0x2c8] sm:$0xff]  ;;  %v237_v56 = vld [vmem:[%s2460_s19 + $0x2d0] sm:$0xff] }
  0x22   : > { %2222 = vmatmul.mubr.msk.f32.gmra.mrb[8].mxu0 %vm277_vm0, %v156_v21  ;;  %v174_v57 = vld [vmem:[%s2460_s19 + $0xd8] sm:$0xff]  ;;  %v175_v59 = vld [vmem:[%s2460_s19 + $0xe0] sm:$0xff]  ;;  %v176_v61 = vld [vmem:[%s2460_s19 + $0xe8] sm:$0xff] }
  0x23   : > { %2318 = vmatmul.mubr.msk.f32.gmra.mrb[8].mxu1 %vm277_vm0, %v220_v22  ;;  %2224 = vmatprep.mubr.msk.f32.mxu0 %vm277_vm0, %v157_v23  ;;  %v238_v58 = vld [vmem:[%s2460_s19 + $0x2d8] sm:$0xff]  ;;  %v239_v60 = vld [vmem:[%s2460_s19 + $0x2e0] sm:$0xff]  ;;  %v240_v62 = vld [vmem:[%s2460_s19 + $0x2e8] sm:$0xff] }
  0x24   : > { %2320 = vmatprep.mubr.msk.f32.mxu1 %vm277_vm0, %v221_v24  ;;  %v177_v63 = vld [vmem:[%s2460_s19 + $0xf0] sm:$0xff]  ;;  %v178_v1 = vld [vmem:[%s2460_s19 + $0xf8] sm:$0xff]  ;;  %v179_v3 = vld [vmem:[%s2460_s19 + $0x100] sm:$0xff] }
  0x25   : > { %v241_v0 = vld [vmem:[%s2460_s19 + $0x2f0] sm:$0xff]  ;;  %v242_v2 = vld [vmem:[%s2460_s19 + $0x2f8] sm:$0xff]  ;;  %v243_v4 = vld [vmem:[%s2460_s19 + $0x300] sm:$0xff] }
  0x26   : > { %2225 = vmatmul.mubr.msk.f32.gmra.mrb[10].mxu0 %vm277_vm0, %v158_v25  ;;  %v180_v5 = vld [vmem:[%s2460_s19 + $0x108] sm:$0xff]  ;;  %v181_v7 = vld [vmem:[%s2460_s19 + $0x110] sm:$0xff]  ;;  %v182_v9 = vld [vmem:[%s2460_s19 + $0x118] sm:$0xff] }
  0x27   : > { %2321 = vmatmul.mubr.msk.f32.gmra.mrb[10].mxu1 %vm277_vm0, %v222_v26  ;;  %2227 = vmatprep.mubr.msk.f32.mxu0 %vm277_vm0, %v159_v27  ;;  %v244_v6 = vld [vmem:[%s2460_s19 + $0x308] sm:$0xff]  ;;  %v245_v8 = vld [vmem:[%s2460_s19 + $0x310] sm:$0xff]  ;;  %v246_v10 = vld [vmem:[%s2460_s19 + $0x318] sm:$0xff] }
  0x28   : > { %2323 = vmatprep.mubr.msk.f32.mxu1 %vm277_vm0, %v223_v28  ;;  %v183_v11 = vld [vmem:[%s2460_s19 + $0x120] sm:$0xff]  ;;  %v184_v13 = vld [vmem:[%s2460_s19 + $0x128] sm:$0xff]  ;;  %v185_v15 = vld [vmem:[%s2460_s19 + $0x130] sm:$0xff] }
  0x29   : > { %v247_v12 = vld [vmem:[%s2460_s19 + $0x320] sm:$0xff]  ;;  %v248_v14 = vld [vmem:[%s2460_s19 + $0x328] sm:$0xff]  ;;  %v249_v16 = vld [vmem:[%s2460_s19 + $0x330] sm:$0xff] }
  0x2a   : > { %2228 = vmatmul.mubr.msk.f32.gmra.mrb[12].mxu0 %vm277_vm0, %v160_v29  ;;  %v186_v17 = vld [vmem:[%s2460_s19 + $0x138] sm:$0xff]  ;;  %v187_v19 = vld [vmem:[%s2460_s19 + $0x140] sm:$0xff]  ;;  %v188_v21 = vld [vmem:[%s2460_s19 + $0x148] sm:$0xff] }
  0x2b   : > { %2324 = vmatmul.mubr.msk.f32.gmra.mrb[12].mxu1 %vm277_vm0, %v224_v30  ;;  %2230 = vmatprep.mubr.msk.f32.mxu0 %vm277_vm0, %v161_v31  ;;  %v250_v18 = vld [vmem:[%s2460_s19 + $0x338] sm:$0xff]  ;;  %v251_v20 = vld [vmem:[%s2460_s19 + $0x340] sm:$0xff]  ;;  %v252_v22 = vld [vmem:[%s2460_s19 + $0x348] sm:$0xff] }
  0x2c   : > { %2326 = vmatprep.mubr.msk.f32.mxu1 %vm277_vm0, %v225_v32  ;;  %v189_v23 = vld [vmem:[%s2460_s19 + $0x150] sm:$0xff]  ;;  %v190_v25 = vld [vmem:[%s2460_s19 + $0x158] sm:$0xff]  ;;  %v191_v27 = vld [vmem:[%s2460_s19 + $0x160] sm:$0xff] }
  0x2d   : > { %v253_v24 = vld [vmem:[%s2460_s19 + $0x350] sm:$0xff]  ;;  %v254_v26 = vld [vmem:[%s2460_s19 + $0x358] sm:$0xff]  ;;  %v255_v28 = vld [vmem:[%s2460_s19 + $0x360] sm:$0xff] }
  0x2e   : > { %2231 = vmatmul.mubr.msk.f32.gmra.mrb[14].mxu0 %vm277_vm0, %v162_v33  ;;  %v192_v29 = vld [vmem:[%s2460_s19 + $0x168] sm:$0xff]  ;;  %v193_v31 = vld [vmem:[%s2460_s19 + $0x170] sm:$0xff]  ;;  %v194_v33 = vld [vmem:[%s2460_s19 + $0x178] sm:$0xff] }
  0x2f   : > { %2327 = vmatmul.mubr.msk.f32.gmra.mrb[14].mxu1 %vm277_vm0, %v226_v34  ;;  %2233 = vmatprep.mubr.msk.f32.mxu0 %vm277_vm0, %v163_v35  ;;  %v256_v30 = vld [vmem:[%s2460_s19 + $0x368] sm:$0xff]  ;;  %v257_v32 = vld [vmem:[%s2460_s19 + $0x370] sm:$0xff]  ;;  %v258_v34 = vld [vmem:[%s2460_s19 + $0x378] sm:$0xff] }
  0x30   : > { %2329 = vmatprep.mubr.msk.f32.mxu1 %vm277_vm0, %v227_v36  ;;  %v195_v35 = vld [vmem:[%s2460_s19 + $0x180] sm:$0xff] }
  0x31   : > { %v259_v36 = vld [vmem:[%s2460_s19 + $0x380] sm:$0xff] }
  0x32   : > { %2234 = vmatmul.mubr.msk.f32.gmra.mrb[16].mxu0 %vm277_vm0, %v164_v37  ;;  %v196_v37 = vld [vmem:[%s2460_s19 + $0x188] sm:$0xff] }
  0x33   : > { %2330 = vmatmul.mubr.msk.f32.gmra.mrb[16].mxu1 %vm277_vm0, %v228_v38  ;;  %2236 = vmatprep.mubr.msk.f32.mxu0 %vm277_vm0, %v165_v39  ;;  %v260_v38 = vld [vmem:[%s2460_s19 + $0x388] sm:$0xff]  ;;  %v197_v39 = vld [vmem:[%s2460_s19 + $0x190] sm:$0xff] }
  0x34   : > { %2332 = vmatprep.mubr.msk.f32.mxu1 %vm277_vm0, %v229_v40  ;;  %v261_v40 = vld [vmem:[%s2460_s19 + $0x390] sm:$0xff] }
  0x36   : > { %2237 = vmatmul.mubr.msk.f32.gmra.mrb[18].mxu0 %vm277_vm0, %v166_v41  ;;  %v198_v41 = vld [vmem:[%s2460_s19 + $0x198] sm:$0xff] }
  0x37   : > { %2333 = vmatmul.mubr.msk.f32.gmra.mrb[18].mxu1 %vm277_vm0, %v230_v42  ;;  %2239 = vmatprep.mubr.msk.f32.mxu0 %vm277_vm0, %v167_v43  ;;  %v262_v42 = vld [vmem:[%s2460_s19 + $0x398] sm:$0xff]  ;;  %v199_v43 = vld [vmem:[%s2460_s19 + $0x1a0] sm:$0xff] }
  0x38   : > { %2335 = vmatprep.mubr.msk.f32.mxu1 %vm277_vm0, %v231_v44  ;;  %v263_v44 = vld [vmem:[%s2460_s19 + $0x3a0] sm:$0xff] }
  0x3a   : > { %2240 = vmatmul.mubr.msk.f32.gmra.mrb[20].mxu0 %vm277_vm0, %v168_v45  ;;  %v200_v45 = vld [vmem:[%s2460_s19 + $0x1a8] sm:$0xff] }
  0x3b   : > { %2336 = vmatmul.mubr.msk.f32.gmra.mrb[20].mxu1 %vm277_vm0, %v232_v46  ;;  %2242 = vmatprep.mubr.msk.f32.mxu0 %vm277_vm0, %v169_v47  ;;  %v264_v46 = vld [vmem:[%s2460_s19 + $0x3a8] sm:$0xff]  ;;  %v201_v47 = vld [vmem:[%s2460_s19 + $0x1b0] sm:$0xff] }
  0x3c   : > { %2338 = vmatprep.mubr.msk.f32.mxu1 %vm277_vm0, %v233_v48  ;;  %v265_v48 = vld [vmem:[%s2460_s19 + $0x3b0] sm:$0xff] }
  0x3e   : > { %2243 = vmatmul.mubr.msk.f32.gmra.mrb[22].mxu0 %vm277_vm0, %v170_v49  ;;  %v202_v49 = vld [vmem:[%s2460_s19 + $0x1b8] sm:$0xff] }
  0x3f   : > { %2339 = vmatmul.mubr.msk.f32.gmra.mrb[22].mxu1 %vm277_vm0, %v234_v50  ;;  %2245 = vmatprep.mubr.msk.f32.mxu0 %vm277_vm0, %v171_v51  ;;  %v266_v50 = vld [vmem:[%s2460_s19 + $0x3b8] sm:$0xff]  ;;  %v203_v51 = vld [vmem:[%s2460_s19 + $0x1c0] sm:$0xff] }
  0x40   : > { %2341 = vmatprep.mubr.msk.f32.mxu1 %vm277_vm0, %v235_v52  ;;  %v267_v52 = vld [vmem:[%s2460_s19 + $0x3c0] sm:$0xff] }
  0x42   : > { %2246 = vmatmul.mubr.msk.f32.gmra.mrb[24].mxu0 %vm277_vm0, %v172_v53  ;;  %v204_v53 = vld [vmem:[%s2460_s19 + $0x1c8] sm:$0xff] }
  0x43   : > { %2342 = vmatmul.mubr.msk.f32.gmra.mrb[24].mxu1 %vm277_vm0, %v236_v54  ;;  %2248 = vmatprep.mubr.msk.f32.mxu0 %vm277_vm0, %v173_v55  ;;  %v268_v54 = vld [vmem:[%s2460_s19 + $0x3c8] sm:$0xff]  ;;  %v205_v55 = vld [vmem:[%s2460_s19 + $0x1d0] sm:$0xff] }
  0x44   : > { %2344 = vmatprep.mubr.msk.f32.mxu1 %vm277_vm0, %v237_v56  ;;  %v269_v56 = vld [vmem:[%s2460_s19 + $0x3d0] sm:$0xff] }
  0x46   : > { %2249 = vmatmul.mubr.msk.f32.gmra.mrb[26].mxu0 %vm277_vm0, %v174_v57  ;;  %v206_v57 = vld [vmem:[%s2460_s19 + $0x1d8] sm:$0xff] }
  0x47   : > { %2345 = vmatmul.mubr.msk.f32.gmra.mrb[26].mxu1 %vm277_vm0, %v238_v58  ;;  %2251 = vmatprep.mubr.msk.f32.mxu0 %vm277_vm0, %v175_v59  ;;  %v270_v58 = vld [vmem:[%s2460_s19 + $0x3d8] sm:$0xff]  ;;  %v207_v59 = vld [vmem:[%s2460_s19 + $0x1e0] sm:$0xff] }
  0x48   : > { %2347 = vmatprep.mubr.msk.f32.mxu1 %vm277_vm0, %v239_v60  ;;  %v271_v60 = vld [vmem:[%s2460_s19 + $0x3e0] sm:$0xff] }
  0x4a   : > { %2252 = vmatmul.mubr.msk.f32.gmra.mrb[28].mxu0 %vm277_vm0, %v176_v61  ;;  %v208_v61 = vld [vmem:[%s2460_s19 + $0x1e8] sm:$0xff] }
  0x4b   : > { %2348 = vmatmul.mubr.msk.f32.gmra.mrb[28].mxu1 %vm277_vm0, %v240_v62  ;;  %2254 = vmatprep.mubr.msk.f32.mxu0 %vm277_vm0, %v177_v63  ;;  %v272_v62 = vld [vmem:[%s2460_s19 + $0x3e8] sm:$0xff]  ;;  %v209_v63 = vld [vmem:[%s2460_s19 + $0x1f0] sm:$0xff] }
  0x4c   : > { %2350 = vmatprep.mubr.msk.f32.mxu1 %vm277_vm0, %v241_v0  ;;  %v273_v0 = vld [vmem:[%s2460_s19 + $0x3f0] sm:$0xff] }
  0x4e   : > { %2255 = vmatmul.mubr.msk.f32.gmra.mrb[30].mxu0 %vm277_vm0, %v178_v1  ;;  %v210_v1 = vld [vmem:[%s2460_s19 + $0x1f8] sm:$0xff] }
  0x4f   : > { %2351 = vmatmul.mubr.msk.f32.gmra.mrb[30].mxu1 %vm277_vm0, %v242_v2  ;;  %2257 = vmatprep.mubr.msk.f32.mxu0 %vm277_vm0, %v179_v3  ;;  %v274_v2 = vld [vmem:[%s2460_s19 + $0x3f8] sm:$0xff] }
  0x50   : > { %2353 = vmatprep.mubr.msk.f32.mxu1 %vm277_vm0, %v243_v4 }
  0x52   : > { %2258 = vmatmul.mubr.msk.f32.gmra.mrb[32].mxu0 %vm277_vm0, %v180_v5 }
  0x53   : > { %2354 = vmatmul.mubr.msk.f32.gmra.mrb[32].mxu1 %vm277_vm0, %v244_v6  ;;  %2260 = vmatprep.mubr.msk.f32.mxu0 %vm277_vm0, %v181_v7 }
  0x54   : > { %2356 = vmatprep.mubr.msk.f32.mxu1 %vm277_vm0, %v245_v8 }
  0x56   : > { %2261 = vmatmul.mubr.msk.f32.gmra.mrb[34].mxu0 %vm277_vm0, %v182_v9 }
  0x57   : > { %2357 = vmatmul.mubr.msk.f32.gmra.mrb[34].mxu1 %vm277_vm0, %v246_v10  ;;  %2263 = vmatprep.mubr.msk.f32.mxu0 %vm277_vm0, %v183_v11 }
  0x58   : > { %2359 = vmatprep.mubr.msk.f32.mxu1 %vm277_vm0, %v247_v12 }
  0x5a   : > { %2264 = vmatmul.mubr.msk.f32.gmra.mrb[36].mxu0 %vm277_vm0, %v184_v13 }
  0x5b   : > { %2360 = vmatmul.mubr.msk.f32.gmra.mrb[36].mxu1 %vm277_vm0, %v248_v14  ;;  %2266 = vmatprep.mubr.msk.f32.mxu0 %vm277_vm0, %v185_v15 }
  0x5c   : > { %2362 = vmatprep.mubr.msk.f32.mxu1 %vm277_vm0, %v249_v16 }
  0x5e   : > { %2267 = vmatmul.mubr.msk.f32.gmra.mrb[38].mxu0 %vm277_vm0, %v186_v17 }
  0x5f   : > { %2363 = vmatmul.mubr.msk.f32.gmra.mrb[38].mxu1 %vm277_vm0, %v250_v18  ;;  %2269 = vmatprep.mubr.msk.f32.mxu0 %vm277_vm0, %v187_v19 }
  0x60   : > { %2365 = vmatprep.mubr.msk.f32.mxu1 %vm277_vm0, %v251_v20 }
  0x62   : > { %2270 = vmatmul.mubr.msk.f32.gmra.mrb[40].mxu0 %vm277_vm0, %v188_v21 }
  0x63   : > { %2366 = vmatmul.mubr.msk.f32.gmra.mrb[40].mxu1 %vm277_vm0, %v252_v22  ;;  %2272 = vmatprep.mubr.msk.f32.mxu0 %vm277_vm0, %v189_v23 }
  0x64   : > { %2368 = vmatprep.mubr.msk.f32.mxu1 %vm277_vm0, %v253_v24 }
  0x66   : > { %2273 = vmatmul.mubr.msk.f32.gmra.mrb[42].mxu0 %vm277_vm0, %v190_v25 }
  0x67   : > { %2369 = vmatmul.mubr.msk.f32.gmra.mrb[42].mxu1 %vm277_vm0, %v254_v26  ;;  %2275 = vmatprep.mubr.msk.f32.mxu0 %vm277_vm0, %v191_v27 }
  0x68   : > { %2371 = vmatprep.mubr.msk.f32.mxu1 %vm277_vm0, %v255_v28 }
  0x6a   : > { %2276 = vmatmul.mubr.msk.f32.gmra.mrb[44].mxu0 %vm277_vm0, %v192_v29 }
  0x6b   : > { %2372 = vmatmul.mubr.msk.f32.gmra.mrb[44].mxu1 %vm277_vm0, %v256_v30  ;;  %2278 = vmatprep.mubr.msk.f32.mxu0 %vm277_vm0, %v193_v31 }
  0x6c   : > { %2374 = vmatprep.mubr.msk.f32.mxu1 %vm277_vm0, %v257_v32 }
  0x6e   : > { %2279 = vmatmul.mubr.msk.f32.gmra.mrb[46].mxu0 %vm277_vm0, %v194_v33 }
  0x6f   : > { %2375 = vmatmul.mubr.msk.f32.gmra.mrb[46].mxu1 %vm277_vm0, %v258_v34  ;;  %2281 = vmatprep.mubr.msk.f32.mxu0 %vm277_vm0, %v195_v35 }
  0x70   : > { %2377 = vmatprep.mubr.msk.f32.mxu1 %vm277_vm0, %v259_v36 }
  0x72   : > { %2282 = vmatmul.mubr.msk.f32.gmra.mrb[48].mxu0 %vm277_vm0, %v196_v37 }
  0x73   : > { %2378 = vmatmul.mubr.msk.f32.gmra.mrb[48].mxu1 %vm277_vm0, %v260_v38  ;;  %2284 = vmatprep.mubr.msk.f32.mxu0 %vm277_vm0, %v197_v39 }
  0x74   : > { %2380 = vmatprep.mubr.msk.f32.mxu1 %vm277_vm0, %v261_v40 }
  0x76   : > { %2285 = vmatmul.mubr.msk.f32.gmra.mrb[50].mxu0 %vm277_vm0, %v198_v41 }
  0x77   : > { %2381 = vmatmul.mubr.msk.f32.gmra.mrb[50].mxu1 %vm277_vm0, %v262_v42  ;;  %2287 = vmatprep.mubr.msk.f32.mxu0 %vm277_vm0, %v199_v43 }
  0x78   : > { %2383 = vmatprep.mubr.msk.f32.mxu1 %vm277_vm0, %v263_v44 }
  0x7a   : > { %2288 = vmatmul.mubr.msk.f32.gmra.mrb[52].mxu0 %vm277_vm0, %v200_v45 }
  0x7b   : > { %2384 = vmatmul.mubr.msk.f32.gmra.mrb[52].mxu1 %vm277_vm0, %v264_v46  ;;  %2290 = vmatprep.mubr.msk.f32.mxu0 %vm277_vm0, %v201_v47 }
  0x7c   : > { %2386 = vmatprep.mubr.msk.f32.mxu1 %vm277_vm0, %v265_v48 }
  0x7e   : > { %2291 = vmatmul.mubr.msk.f32.gmra.mrb[54].mxu0 %vm277_vm0, %v202_v49 }
  0x7f   : > { %2387 = vmatmul.mubr.msk.f32.gmra.mrb[54].mxu1 %vm277_vm0, %v266_v50  ;;  %2293 = vmatprep.mubr.msk.f32.mxu0 %vm277_vm0, %v203_v51 }
  0x80   : > { %2389 = vmatprep.mubr.msk.f32.mxu1 %vm277_vm0, %v267_v52 }
  0x82   : > { %2294 = vmatmul.mubr.msk.f32.gmra.mrb[56].mxu0 %vm277_vm0, %v204_v53 }
  0x83   : > { %2390 = vmatmul.mubr.msk.f32.gmra.mrb[56].mxu1 %vm277_vm0, %v268_v54  ;;  %2296 = vmatprep.mubr.msk.f32.mxu0 %vm277_vm0, %v205_v55 }
  0x84   : > { %2392 = vmatprep.mubr.msk.f32.mxu1 %vm277_vm0, %v269_v56 }
  0x86   : > { %2297 = vmatmul.mubr.msk.f32.gmra.mrb[58].mxu0 %vm277_vm0, %v206_v57 }
  0x87   : > { %2393 = vmatmul.mubr.msk.f32.gmra.mrb[58].mxu1 %vm277_vm0, %v270_v58  ;;  %2299 = vmatprep.mubr.msk.f32.mxu0 %vm277_vm0, %v207_v59 }
  0x88   : > { %2395 = vmatprep.mubr.msk.f32.mxu1 %vm277_vm0, %v271_v60 }
  0x8a   : > { %2300 = vmatmul.mubr.msk.f32.gmra.mrb[60].mxu0 %vm277_vm0, %v208_v61 }
  0x8b   : > { %2396 = vmatmul.mubr.msk.f32.gmra.mrb[60].mxu1 %vm277_vm0, %v272_v62  ;;  %2302 = vmatprep.mubr.msk.f32.mxu0 %vm277_vm0, %v209_v63 }
  0x8c   : > { %2398 = vmatprep.mubr.msk.f32.mxu1 %vm277_vm0, %v273_v0 }
  0x8e   : > { %2303 = vmatmul.mubr.msk.f32.gmra.mrb[62].mxu0 %vm277_vm0, %v210_v1 }
  0x8f   : > { %2399 = vmatmul.mubr.msk.f32.gmra.mrb[62].mxu1 %vm277_vm0, %v274_v2 }
  0xe5   : > { %v2211_v3 = vpop.f32.mrb[0].mxu0 }
  0xe6   : > { %v2307_v4 = vpop.f32.mrb[0].mxu1  ;;  %vm1368_vm2 = vcmp.ge.f32.partialorder %v2211_v3, 0.0  ;;  %v1496_v5 = vmul.f32 0.2, %v2211_v3  ;;  %v728_v7 = vpop.f32.mrb[1].mxu0 }
  0xe7   : > { %vm1432_vm3 = vcmp.ge.f32.partialorder %v2307_v4, 0.0  ;;  %v1560_v6 = vmul.f32 0.2, %v2307_v4  ;;  %v1048_v8 = vpop.f32.mrb[1].mxu1  ;;  %vm1367_vm4 = vcmp.ge.f32.partialorder %v728_v7, 0.0 }
  0xe8   : > { %v1624_v9 = vsel %vm1368_vm2, %v2211_v3, %v1496_v5  ;;  %v1495_v11 = vmul.f32 0.2, %v728_v7  ;;  %vm1431_vm5 = vcmp.ge.f32.partialorder %v1048_v8, 0.0  ;;  %v1559_v12 = vmul.f32 0.2, %v1048_v8 }
  0xe9   : > { %v1688_v10 = vsel %vm1432_vm3, %v2307_v4, %v1560_v6  ;;  %1753 = vst.msk [vmem:[%s2723_s22 + $0x8] sm:$0xff] %vm1751_vm1, %v1624_v9  ;;  %v2214_v13 = vpop.f32.mrb[2].mxu0 }
  0xea   : > { %1817 = vst.msk [vmem:[%s2723_s22 + $0x208] sm:$0xff] %vm1751_vm1, %v1688_v10  ;;  %v2310_v14 = vpop.f32.mrb[2].mxu1  ;;  %v1623_v15 = vsel %vm1367_vm4, %v728_v7, %v1495_v11  ;;  %vm1370_vm6 = vcmp.ge.f32.partialorder %v2214_v13, 0.0  ;;  %v1498_v16 = vmul.f32 0.2, %v2214_v13  ;;  %v738_v17 = vpop.f32.mrb[3].mxu0  ;;  %v1687_v19 = vsel %vm1431_vm5, %v1048_v8, %v1559_v12 }
  0xeb   : > { %vm1434_vm7 = vcmp.ge.f32.partialorder %v2310_v14, 0.0  ;;  %v1058_v18 = vpop.f32.mrb[3].mxu1  ;;  %1752 = vst.msk [vmem:[%s2723_s22] sm:$0xff] %vm1751_vm1, %v1623_v15  ;;  %v1562_v20 = vmul.f32 0.2, %v2310_v14  ;;  %vm1369_vm8 = vcmp.ge.f32.partialorder %v738_v17, 0.0 }
  0xec   : > { %v1497_v21 = vmul.f32 0.2, %v738_v17  ;;  %1816 = vst.msk [vmem:[%s2723_s22 + $0x200] sm:$0xff] %vm1751_vm1, %v1687_v19  ;;  %v1626_v22 = vsel %vm1370_vm6, %v2214_v13, %v1498_v16  ;;  %vm1433_vm9 = vcmp.ge.f32.partialorder %v1058_v18, 0.0  ;;  %v1561_v23 = vmul.f32 0.2, %v1058_v18 }
  0xed   : > { %1755 = vst.msk [vmem:[%s2723_s22 + $0x18] sm:$0xff] %vm1751_vm1, %v1626_v22  ;;  %v1690_v24 = vsel %vm1434_vm7, %v2310_v14, %v1562_v20  ;;  %v2217_v26 = vpop.f32.mrb[4].mxu0 }
  0xee   : > { %v1625_v25 = vsel %vm1369_vm8, %v738_v17, %v1497_v21  ;;  %v2313_v27 = vpop.f32.mrb[4].mxu1  ;;  %1819 = vst.msk [vmem:[%s2723_s22 + $0x218] sm:$0xff] %vm1751_vm1, %v1690_v24  ;;  %v1689_v28 = vsel %vm1433_vm9, %v1058_v18, %v1561_v23  ;;  %vm1372_vm10 = vcmp.ge.f32.partialorder %v2217_v26, 0.0  ;;  %v1500_v29 = vmul.f32 0.2, %v2217_v26  ;;  %v748_v30 = vpop.f32.mrb[5].mxu0 }
  0xef   : > { %1754 = vst.msk [vmem:[%s2723_s22 + $0x10] sm:$0xff] %vm1751_vm1, %v1625_v25  ;;  %vm1436_vm11 = vcmp.ge.f32.partialorder %v2313_v27, 0.0  ;;  %v1068_v31 = vpop.f32.mrb[5].mxu1  ;;  %1818 = vst.msk [vmem:[%s2723_s22 + $0x210] sm:$0xff] %vm1751_vm1, %v1689_v28  ;;  %v1564_v32 = vmul.f32 0.2, %v2313_v27 }
  0xf0   : > { %vm1371_vm12 = vcmp.ge.f32.partialorder %v748_v30, 0.0  ;;  %v1499_v33 = vmul.f32 0.2, %v748_v30  ;;  %vm1435_vm13 = vcmp.ge.f32.partialorder %v1068_v31, 0.0  ;;  %v1628_v34 = vsel %vm1372_vm10, %v2217_v26, %v1500_v29 }
  0xf1   : > { %v1563_v35 = vmul.f32 0.2, %v1068_v31  ;;  %1757 = vst.msk [vmem:[%s2723_s22 + $0x28] sm:$0xff] %vm1751_vm1, %v1628_v34  ;;  %v1692_v36 = vsel %vm1436_vm11, %v2313_v27, %v1564_v32  ;;  %v2220_v38 = vpop.f32.mrb[6].mxu0 }
  0xf2   : > { %v1627_v37 = vsel %vm1371_vm12, %v748_v30, %v1499_v33  ;;  %v2316_v39 = vpop.f32.mrb[6].mxu1  ;;  %1821 = vst.msk [vmem:[%s2723_s22 + $0x228] sm:$0xff] %vm1751_vm1, %v1692_v36  ;;  %vm1374_vm14 = vcmp.ge.f32.partialorder %v2220_v38, 0.0  ;;  %v1502_v41 = vmul.f32 0.2, %v2220_v38  ;;  %v758_v42 = vpop.f32.mrb[7].mxu0 }
  0xf3   : > { %1756 = vst.msk [vmem:[%s2723_s22 + $0x20] sm:$0xff] %vm1751_vm1, %v1627_v37  ;;  %v1691_v40 = vsel %vm1435_vm13, %v1068_v31, %v1563_v35  ;;  %vm1438_vm15 = vcmp.ge.f32.partialorder %v2316_v39, 0.0  ;;  %v1078_v43 = vpop.f32.mrb[7].mxu1  ;;  %v1566_v44 = vmul.f32 0.2, %v2316_v39  ;;  %vm1373_vm0 = vcmp.ge.f32.partialorder %v758_v42, 0.0 }
  0xf4   : > { %1820 = vst.msk [vmem:[%s2723_s22 + $0x220] sm:$0xff] %vm1751_vm1, %v1691_v40  ;;  %v1501_v45 = vmul.f32 0.2, %v758_v42  ;;  %vm1437_vm2 = vcmp.ge.f32.partialorder %v1078_v43, 0.0  ;;  %v1630_v46 = vsel %vm1374_vm14, %v2220_v38, %v1502_v41  ;;  %v1565_v47 = vmul.f32 0.2, %v1078_v43 }
  0xf5   : > { %1759 = vst.msk [vmem:[%s2723_s22 + $0x38] sm:$0xff] %vm1751_vm1, %v1630_v46  ;;  %v1694_v48 = vsel %vm1438_vm15, %v2316_v39, %v1566_v44  ;;  %v2223_v50 = vpop.f32.mrb[8].mxu0 }
  0xf6   : > { %v1629_v49 = vsel %vm1373_vm0, %v758_v42, %v1501_v45  ;;  %v2319_v51 = vpop.f32.mrb[8].mxu1  ;;  %1823 = vst.msk [vmem:[%s2723_s22 + $0x238] sm:$0xff] %vm1751_vm1, %v1694_v48  ;;  %v1693_v52 = vsel %vm1437_vm2, %v1078_v43, %v1565_v47  ;;  %vm1376_vm3 = vcmp.ge.f32.partialorder %v2223_v50, 0.0  ;;  %v1504_v53 = vmul.f32 0.2, %v2223_v50  ;;  %v768_v54 = vpop.f32.mrb[9].mxu0 }
  0xf7   : > { %1758 = vst.msk [vmem:[%s2723_s22 + $0x30] sm:$0xff] %vm1751_vm1, %v1629_v49  ;;  %vm1440_vm4 = vcmp.ge.f32.partialorder %v2319_v51, 0.0  ;;  %v1088_v55 = vpop.f32.mrb[9].mxu1  ;;  %1822 = vst.msk [vmem:[%s2723_s22 + $0x230] sm:$0xff] %vm1751_vm1, %v1693_v52  ;;  %v1568_v56 = vmul.f32 0.2, %v2319_v51 }
  0xf8   : > { %vm1375_vm5 = vcmp.ge.f32.partialorder %v768_v54, 0.0  ;;  %v1503_v57 = vmul.f32 0.2, %v768_v54  ;;  %vm1439_vm6 = vcmp.ge.f32.partialorder %v1088_v55, 0.0  ;;  %v1632_v58 = vsel %vm1376_vm3, %v2223_v50, %v1504_v53 }
  0xf9   : > { %v1567_v59 = vmul.f32 0.2, %v1088_v55  ;;  %1761 = vst.msk [vmem:[%s2723_s22 + $0x48] sm:$0xff] %vm1751_vm1, %v1632_v58  ;;  %v1696_v60 = vsel %vm1440_vm4, %v2319_v51, %v1568_v56  ;;  %v2226_v62 = vpop.f32.mrb[10].mxu0 }
  0xfa   : > { %v1631_v61 = vsel %vm1375_vm5, %v768_v54, %v1503_v57  ;;  %v2322_v63 = vpop.f32.mrb[10].mxu1  ;;  %1825 = vst.msk [vmem:[%s2723_s22 + $0x248] sm:$0xff] %vm1751_vm1, %v1696_v60  ;;  %vm1378_vm7 = vcmp.ge.f32.partialorder %v2226_v62, 0.0  ;;  %v1506_v1 = vmul.f32 0.2, %v2226_v62  ;;  %v778_v2 = vpop.f32.mrb[11].mxu0 }
  0xfb   : > { %1760 = vst.msk [vmem:[%s2723_s22 + $0x40] sm:$0xff] %vm1751_vm1, %v1631_v61  ;;  %v1695_v0 = vsel %vm1439_vm6, %v1088_v55, %v1567_v59  ;;  %vm1442_vm8 = vcmp.ge.f32.partialorder %v2322_v63, 0.0  ;;  %v1098_v3 = vpop.f32.mrb[11].mxu1  ;;  %v1570_v4 = vmul.f32 0.2, %v2322_v63  ;;  %vm1377_vm9 = vcmp.ge.f32.partialorder %v778_v2, 0.0 }
  0xfc   : > { %1824 = vst.msk [vmem:[%s2723_s22 + $0x240] sm:$0xff] %vm1751_vm1, %v1695_v0  ;;  %v1505_v5 = vmul.f32 0.2, %v778_v2  ;;  %vm1441_vm10 = vcmp.ge.f32.partialorder %v1098_v3, 0.0  ;;  %v1634_v6 = vsel %vm1378_vm7, %v2226_v62, %v1506_v1  ;;  %v1569_v7 = vmul.f32 0.2, %v1098_v3 }
  0xfd   : > { %1763 = vst.msk [vmem:[%s2723_s22 + $0x58] sm:$0xff] %vm1751_vm1, %v1634_v6  ;;  %v1698_v8 = vsel %vm1442_vm8, %v2322_v63, %v1570_v4  ;;  %v2229_v10 = vpop.f32.mrb[12].mxu0 }
  0xfe   : > { %v1633_v9 = vsel %vm1377_vm9, %v778_v2, %v1505_v5  ;;  %v2325_v11 = vpop.f32.mrb[12].mxu1  ;;  %1827 = vst.msk [vmem:[%s2723_s22 + $0x258] sm:$0xff] %vm1751_vm1, %v1698_v8  ;;  %v1697_v12 = vsel %vm1441_vm10, %v1098_v3, %v1569_v7  ;;  %vm1380_vm11 = vcmp.ge.f32.partialorder %v2229_v10, 0.0  ;;  %v1508_v13 = vmul.f32 0.2, %v2229_v10  ;;  %v788_v14 = vpop.f32.mrb[13].mxu0 }
  0xff   : > { %1762 = vst.msk [vmem:[%s2723_s22 + $0x50] sm:$0xff] %vm1751_vm1, %v1633_v9  ;;  %vm1444_vm12 = vcmp.ge.f32.partialorder %v2325_v11, 0.0  ;;  %v1108_v15 = vpop.f32.mrb[13].mxu1  ;;  %1826 = vst.msk [vmem:[%s2723_s22 + $0x250] sm:$0xff] %vm1751_vm1, %v1697_v12  ;;  %v1572_v16 = vmul.f32 0.2, %v2325_v11 }
 0x100   : > { %vm1379_vm13 = vcmp.ge.f32.partialorder %v788_v14, 0.0  ;;  %v1507_v17 = vmul.f32 0.2, %v788_v14  ;;  %vm1443_vm14 = vcmp.ge.f32.partialorder %v1108_v15, 0.0  ;;  %v1636_v18 = vsel %vm1380_vm11, %v2229_v10, %v1508_v13 }
 0x101   : > { %v1571_v19 = vmul.f32 0.2, %v1108_v15  ;;  %1765 = vst.msk [vmem:[%s2723_s22 + $0x68] sm:$0xff] %vm1751_vm1, %v1636_v18  ;;  %v1700_v20 = vsel %vm1444_vm12, %v2325_v11, %v1572_v16  ;;  %v2232_v22 = vpop.f32.mrb[14].mxu0 }
 0x102   : > { %v1635_v21 = vsel %vm1379_vm13, %v788_v14, %v1507_v17  ;;  %v2328_v23 = vpop.f32.mrb[14].mxu1  ;;  %1829 = vst.msk [vmem:[%s2723_s22 + $0x268] sm:$0xff] %vm1751_vm1, %v1700_v20  ;;  %vm1382_vm15 = vcmp.ge.f32.partialorder %v2232_v22, 0.0  ;;  %v1510_v25 = vmul.f32 0.2, %v2232_v22  ;;  %v798_v26 = vpop.f32.mrb[15].mxu0 }
 0x103   : > { %1764 = vst.msk [vmem:[%s2723_s22 + $0x60] sm:$0xff] %vm1751_vm1, %v1635_v21  ;;  %v1699_v24 = vsel %vm1443_vm14, %v1108_v15, %v1571_v19  ;;  %vm1446_vm0 = vcmp.ge.f32.partialorder %v2328_v23, 0.0  ;;  %v1118_v27 = vpop.f32.mrb[15].mxu1  ;;  %v1574_v28 = vmul.f32 0.2, %v2328_v23  ;;  %vm1381_vm2 = vcmp.ge.f32.partialorder %v798_v26, 0.0 }
 0x104   : > { %1828 = vst.msk [vmem:[%s2723_s22 + $0x260] sm:$0xff] %vm1751_vm1, %v1699_v24  ;;  %v1509_v29 = vmul.f32 0.2, %v798_v26  ;;  %vm1445_vm3 = vcmp.ge.f32.partialorder %v1118_v27, 0.0  ;;  %v1638_v30 = vsel %vm1382_vm15, %v2232_v22, %v1510_v25  ;;  %v1573_v31 = vmul.f32 0.2, %v1118_v27 }
 0x105   : > { %1767 = vst.msk [vmem:[%s2723_s22 + $0x78] sm:$0xff] %vm1751_vm1, %v1638_v30  ;;  %v1702_v32 = vsel %vm1446_vm0, %v2328_v23, %v1574_v28  ;;  %v2235_v34 = vpop.f32.mrb[16].mxu0 }
 0x106   : > { %v1637_v33 = vsel %vm1381_vm2, %v798_v26, %v1509_v29  ;;  %v2331_v35 = vpop.f32.mrb[16].mxu1  ;;  %1831 = vst.msk [vmem:[%s2723_s22 + $0x278] sm:$0xff] %vm1751_vm1, %v1702_v32  ;;  %v1701_v36 = vsel %vm1445_vm3, %v1118_v27, %v1573_v31  ;;  %vm1384_vm4 = vcmp.ge.f32.partialorder %v2235_v34, 0.0  ;;  %v1512_v37 = vmul.f32 0.2, %v2235_v34  ;;  %v808_v38 = vpop.f32.mrb[17].mxu0 }
 0x107   : > { %1766 = vst.msk [vmem:[%s2723_s22 + $0x70] sm:$0xff] %vm1751_vm1, %v1637_v33  ;;  %vm1448_vm5 = vcmp.ge.f32.partialorder %v2331_v35, 0.0  ;;  %v1128_v39 = vpop.f32.mrb[17].mxu1  ;;  %1830 = vst.msk [vmem:[%s2723_s22 + $0x270] sm:$0xff] %vm1751_vm1, %v1701_v36  ;;  %v1576_v40 = vmul.f32 0.2, %v2331_v35 }
 0x108   : > { %vm1383_vm6 = vcmp.ge.f32.partialorder %v808_v38, 0.0  ;;  %v1511_v41 = vmul.f32 0.2, %v808_v38  ;;  %vm1447_vm7 = vcmp.ge.f32.partialorder %v1128_v39, 0.0  ;;  %v1640_v42 = vsel %vm1384_vm4, %v2235_v34, %v1512_v37 }
 0x109   : > { %v1575_v43 = vmul.f32 0.2, %v1128_v39  ;;  %1769 = vst.msk [vmem:[%s2723_s22 + $0x88] sm:$0xff] %vm1751_vm1, %v1640_v42  ;;  %v1704_v44 = vsel %vm1448_vm5, %v2331_v35, %v1576_v40  ;;  %v2238_v46 = vpop.f32.mrb[18].mxu0 }
 0x10a   : > { %v1639_v45 = vsel %vm1383_vm6, %v808_v38, %v1511_v41  ;;  %v2334_v47 = vpop.f32.mrb[18].mxu1  ;;  %1833 = vst.msk [vmem:[%s2723_s22 + $0x288] sm:$0xff] %vm1751_vm1, %v1704_v44  ;;  %vm1386_vm8 = vcmp.ge.f32.partialorder %v2238_v46, 0.0  ;;  %v1514_v49 = vmul.f32 0.2, %v2238_v46  ;;  %v818_v50 = vpop.f32.mrb[19].mxu0 }
 0x10b   : > { %1768 = vst.msk [vmem:[%s2723_s22 + $0x80] sm:$0xff] %vm1751_vm1, %v1639_v45  ;;  %v1703_v48 = vsel %vm1447_vm7, %v1128_v39, %v1575_v43  ;;  %vm1450_vm9 = vcmp.ge.f32.partialorder %v2334_v47, 0.0  ;;  %v1138_v51 = vpop.f32.mrb[19].mxu1  ;;  %v1578_v52 = vmul.f32 0.2, %v2334_v47  ;;  %vm1385_vm10 = vcmp.ge.f32.partialorder %v818_v50, 0.0 }
 0x10c   : > { %1832 = vst.msk [vmem:[%s2723_s22 + $0x280] sm:$0xff] %vm1751_vm1, %v1703_v48  ;;  %v1513_v53 = vmul.f32 0.2, %v818_v50  ;;  %vm1449_vm11 = vcmp.ge.f32.partialorder %v1138_v51, 0.0  ;;  %v1642_v54 = vsel %vm1386_vm8, %v2238_v46, %v1514_v49  ;;  %v1577_v55 = vmul.f32 0.2, %v1138_v51 }
 0x10d   : > { %1771 = vst.msk [vmem:[%s2723_s22 + $0x98] sm:$0xff] %vm1751_vm1, %v1642_v54  ;;  %v1706_v56 = vsel %vm1450_vm9, %v2334_v47, %v1578_v52  ;;  %v2241_v58 = vpop.f32.mrb[20].mxu0 }
 0x10e   : > { %v1641_v57 = vsel %vm1385_vm10, %v818_v50, %v1513_v53  ;;  %v2337_v59 = vpop.f32.mrb[20].mxu1  ;;  %1835 = vst.msk [vmem:[%s2723_s22 + $0x298] sm:$0xff] %vm1751_vm1, %v1706_v56  ;;  %v1705_v60 = vsel %vm1449_vm11, %v1138_v51, %v1577_v55  ;;  %vm1388_vm12 = vcmp.ge.f32.partialorder %v2241_v58, 0.0  ;;  %v1516_v61 = vmul.f32 0.2, %v2241_v58  ;;  %v828_v62 = vpop.f32.mrb[21].mxu0 }
 0x10f   : > { %1770 = vst.msk [vmem:[%s2723_s22 + $0x90] sm:$0xff] %vm1751_vm1, %v1641_v57  ;;  %vm1452_vm13 = vcmp.ge.f32.partialorder %v2337_v59, 0.0  ;;  %v1148_v63 = vpop.f32.mrb[21].mxu1  ;;  %1834 = vst.msk [vmem:[%s2723_s22 + $0x290] sm:$0xff] %vm1751_vm1, %v1705_v60  ;;  %v1580_v0 = vmul.f32 0.2, %v2337_v59 }
 0x110   : > { %vm1387_vm14 = vcmp.ge.f32.partialorder %v828_v62, 0.0  ;;  %v1515_v1 = vmul.f32 0.2, %v828_v62  ;;  %vm1451_vm15 = vcmp.ge.f32.partialorder %v1148_v63, 0.0  ;;  %v1644_v2 = vsel %vm1388_vm12, %v2241_v58, %v1516_v61 }
 0x111   : > { %v1579_v3 = vmul.f32 0.2, %v1148_v63  ;;  %1773 = vst.msk [vmem:[%s2723_s22 + $0xa8] sm:$0xff] %vm1751_vm1, %v1644_v2  ;;  %v1708_v4 = vsel %vm1452_vm13, %v2337_v59, %v1580_v0  ;;  %v2244_v6 = vpop.f32.mrb[22].mxu0 }
 0x112   : > { %v1643_v5 = vsel %vm1387_vm14, %v828_v62, %v1515_v1  ;;  %v2340_v7 = vpop.f32.mrb[22].mxu1  ;;  %1837 = vst.msk [vmem:[%s2723_s22 + $0x2a8] sm:$0xff] %vm1751_vm1, %v1708_v4  ;;  %vm1390_vm0 = vcmp.ge.f32.partialorder %v2244_v6, 0.0  ;;  %v1518_v9 = vmul.f32 0.2, %v2244_v6  ;;  %v838_v10 = vpop.f32.mrb[23].mxu0 }
 0x113   : > { %1772 = vst.msk [vmem:[%s2723_s22 + $0xa0] sm:$0xff] %vm1751_vm1, %v1643_v5  ;;  %v1707_v8 = vsel %vm1451_vm15, %v1148_v63, %v1579_v3  ;;  %vm1454_vm2 = vcmp.ge.f32.partialorder %v2340_v7, 0.0  ;;  %v1158_v11 = vpop.f32.mrb[23].mxu1  ;;  %v1582_v12 = vmul.f32 0.2, %v2340_v7  ;;  %vm1389_vm3 = vcmp.ge.f32.partialorder %v838_v10, 0.0 }
 0x114   : > { %1836 = vst.msk [vmem:[%s2723_s22 + $0x2a0] sm:$0xff] %vm1751_vm1, %v1707_v8  ;;  %v1517_v13 = vmul.f32 0.2, %v838_v10  ;;  %vm1453_vm4 = vcmp.ge.f32.partialorder %v1158_v11, 0.0  ;;  %v1646_v14 = vsel %vm1390_vm0, %v2244_v6, %v1518_v9  ;;  %v1581_v15 = vmul.f32 0.2, %v1158_v11 }
 0x115   : > { %1775 = vst.msk [vmem:[%s2723_s22 + $0xb8] sm:$0xff] %vm1751_vm1, %v1646_v14  ;;  %v1710_v16 = vsel %vm1454_vm2, %v2340_v7, %v1582_v12  ;;  %v2247_v18 = vpop.f32.mrb[24].mxu0 }
 0x116   : > { %v1645_v17 = vsel %vm1389_vm3, %v838_v10, %v1517_v13  ;;  %v2343_v19 = vpop.f32.mrb[24].mxu1  ;;  %1839 = vst.msk [vmem:[%s2723_s22 + $0x2b8] sm:$0xff] %vm1751_vm1, %v1710_v16  ;;  %v1709_v20 = vsel %vm1453_vm4, %v1158_v11, %v1581_v15  ;;  %vm1392_vm5 = vcmp.ge.f32.partialorder %v2247_v18, 0.0  ;;  %v1520_v21 = vmul.f32 0.2, %v2247_v18  ;;  %v848_v22 = vpop.f32.mrb[25].mxu0 }
 0x117   : > { %1774 = vst.msk [vmem:[%s2723_s22 + $0xb0] sm:$0xff] %vm1751_vm1, %v1645_v17  ;;  %vm1456_vm6 = vcmp.ge.f32.partialorder %v2343_v19, 0.0  ;;  %v1168_v23 = vpop.f32.mrb[25].mxu1  ;;  %1838 = vst.msk [vmem:[%s2723_s22 + $0x2b0] sm:$0xff] %vm1751_vm1, %v1709_v20  ;;  %v1584_v24 = vmul.f32 0.2, %v2343_v19 }
 0x118   : > { %vm1391_vm7 = vcmp.ge.f32.partialorder %v848_v22, 0.0  ;;  %v1519_v25 = vmul.f32 0.2, %v848_v22  ;;  %vm1455_vm8 = vcmp.ge.f32.partialorder %v1168_v23, 0.0  ;;  %v1648_v26 = vsel %vm1392_vm5, %v2247_v18, %v1520_v21 }
 0x119   : > { %v1583_v27 = vmul.f32 0.2, %v1168_v23  ;;  %1777 = vst.msk [vmem:[%s2723_s22 + $0xc8] sm:$0xff] %vm1751_vm1, %v1648_v26  ;;  %v1712_v28 = vsel %vm1456_vm6, %v2343_v19, %v1584_v24  ;;  %v2250_v30 = vpop.f32.mrb[26].mxu0 }
 0x11a   : > { %v1647_v29 = vsel %vm1391_vm7, %v848_v22, %v1519_v25  ;;  %v2346_v31 = vpop.f32.mrb[26].mxu1  ;;  %1841 = vst.msk [vmem:[%s2723_s22 + $0x2c8] sm:$0xff] %vm1751_vm1, %v1712_v28  ;;  %vm1394_vm9 = vcmp.ge.f32.partialorder %v2250_v30, 0.0  ;;  %v1522_v33 = vmul.f32 0.2, %v2250_v30  ;;  %v858_v34 = vpop.f32.mrb[27].mxu0 }
 0x11b   : > { %1776 = vst.msk [vmem:[%s2723_s22 + $0xc0] sm:$0xff] %vm1751_vm1, %v1647_v29  ;;  %v1711_v32 = vsel %vm1455_vm8, %v1168_v23, %v1583_v27  ;;  %vm1458_vm10 = vcmp.ge.f32.partialorder %v2346_v31, 0.0  ;;  %v1178_v35 = vpop.f32.mrb[27].mxu1  ;;  %v1586_v36 = vmul.f32 0.2, %v2346_v31  ;;  %vm1393_vm11 = vcmp.ge.f32.partialorder %v858_v34, 0.0 }
 0x11c   : > { %1840 = vst.msk [vmem:[%s2723_s22 + $0x2c0] sm:$0xff] %vm1751_vm1, %v1711_v32  ;;  %v1521_v37 = vmul.f32 0.2, %v858_v34  ;;  %vm1457_vm12 = vcmp.ge.f32.partialorder %v1178_v35, 0.0  ;;  %v1650_v38 = vsel %vm1394_vm9, %v2250_v30, %v1522_v33  ;;  %v1585_v39 = vmul.f32 0.2, %v1178_v35 }
 0x11d   : > { %1779 = vst.msk [vmem:[%s2723_s22 + $0xd8] sm:$0xff] %vm1751_vm1, %v1650_v38  ;;  %v1714_v40 = vsel %vm1458_vm10, %v2346_v31, %v1586_v36  ;;  %v2253_v42 = vpop.f32.mrb[28].mxu0 }
 0x11e   : > { %v1649_v41 = vsel %vm1393_vm11, %v858_v34, %v1521_v37  ;;  %v2349_v43 = vpop.f32.mrb[28].mxu1  ;;  %1843 = vst.msk [vmem:[%s2723_s22 + $0x2d8] sm:$0xff] %vm1751_vm1, %v1714_v40  ;;  %v1713_v44 = vsel %vm1457_vm12, %v1178_v35, %v1585_v39  ;;  %vm1396_vm13 = vcmp.ge.f32.partialorder %v2253_v42, 0.0  ;;  %v1524_v45 = vmul.f32 0.2, %v2253_v42  ;;  %v868_v46 = vpop.f32.mrb[29].mxu0 }
 0x11f   : > { %1778 = vst.msk [vmem:[%s2723_s22 + $0xd0] sm:$0xff] %vm1751_vm1, %v1649_v41  ;;  %vm1460_vm14 = vcmp.ge.f32.partialorder %v2349_v43, 0.0  ;;  %v1188_v47 = vpop.f32.mrb[29].mxu1  ;;  %1842 = vst.msk [vmem:[%s2723_s22 + $0x2d0] sm:$0xff] %vm1751_vm1, %v1713_v44  ;;  %v1588_v48 = vmul.f32 0.2, %v2349_v43 }
 0x120   : > { %vm1395_vm15 = vcmp.ge.f32.partialorder %v868_v46, 0.0  ;;  %v1523_v49 = vmul.f32 0.2, %v868_v46  ;;  %vm1459_vm0 = vcmp.ge.f32.partialorder %v1188_v47, 0.0  ;;  %v1652_v50 = vsel %vm1396_vm13, %v2253_v42, %v1524_v45 }
 0x121   : > { %v1587_v51 = vmul.f32 0.2, %v1188_v47  ;;  %1781 = vst.msk [vmem:[%s2723_s22 + $0xe8] sm:$0xff] %vm1751_vm1, %v1652_v50  ;;  %v1716_v52 = vsel %vm1460_vm14, %v2349_v43, %v1588_v48  ;;  %v2256_v54 = vpop.f32.mrb[30].mxu0 }
 0x122   : > { %v1651_v53 = vsel %vm1395_vm15, %v868_v46, %v1523_v49  ;;  %v2352_v55 = vpop.f32.mrb[30].mxu1  ;;  %1845 = vst.msk [vmem:[%s2723_s22 + $0x2e8] sm:$0xff] %vm1751_vm1, %v1716_v52  ;;  %vm1398_vm2 = vcmp.ge.f32.partialorder %v2256_v54, 0.0  ;;  %v1526_v57 = vmul.f32 0.2, %v2256_v54  ;;  %v878_v58 = vpop.f32.mrb[31].mxu0 }
 0x123   : > { %1780 = vst.msk [vmem:[%s2723_s22 + $0xe0] sm:$0xff] %vm1751_vm1, %v1651_v53  ;;  %v1715_v56 = vsel %vm1459_vm0, %v1188_v47, %v1587_v51  ;;  %vm1462_vm3 = vcmp.ge.f32.partialorder %v2352_v55, 0.0  ;;  %v1198_v59 = vpop.f32.mrb[31].mxu1  ;;  %v1590_v60 = vmul.f32 0.2, %v2352_v55  ;;  %vm1397_vm4 = vcmp.ge.f32.partialorder %v878_v58, 0.0 }
 0x124   : > { %1844 = vst.msk [vmem:[%s2723_s22 + $0x2e0] sm:$0xff] %vm1751_vm1, %v1715_v56  ;;  %v1525_v61 = vmul.f32 0.2, %v878_v58  ;;  %vm1461_vm5 = vcmp.ge.f32.partialorder %v1198_v59, 0.0  ;;  %v1654_v62 = vsel %vm1398_vm2, %v2256_v54, %v1526_v57  ;;  %v1589_v63 = vmul.f32 0.2, %v1198_v59 }
 0x125   : > { %1783 = vst.msk [vmem:[%s2723_s22 + $0xf8] sm:$0xff] %vm1751_vm1, %v1654_v62  ;;  %v1718_v0 = vsel %vm1462_vm3, %v2352_v55, %v1590_v60  ;;  %v2259_v2 = vpop.f32.mrb[32].mxu0 }
 0x126   : > { %v1653_v1 = vsel %vm1397_vm4, %v878_v58, %v1525_v61  ;;  %v2355_v3 = vpop.f32.mrb[32].mxu1  ;;  %1847 = vst.msk [vmem:[%s2723_s22 + $0x2f8] sm:$0xff] %vm1751_vm1, %v1718_v0  ;;  %v1717_v4 = vsel %vm1461_vm5, %v1198_v59, %v1589_v63  ;;  %vm1400_vm6 = vcmp.ge.f32.partialorder %v2259_v2, 0.0  ;;  %v1528_v5 = vmul.f32 0.2, %v2259_v2  ;;  %v888_v6 = vpop.f32.mrb[33].mxu0 }
 0x127   : > { %1782 = vst.msk [vmem:[%s2723_s22 + $0xf0] sm:$0xff] %vm1751_vm1, %v1653_v1  ;;  %vm1464_vm7 = vcmp.ge.f32.partialorder %v2355_v3, 0.0  ;;  %v1208_v7 = vpop.f32.mrb[33].mxu1  ;;  %1846 = vst.msk [vmem:[%s2723_s22 + $0x2f0] sm:$0xff] %vm1751_vm1, %v1717_v4  ;;  %v1592_v8 = vmul.f32 0.2, %v2355_v3 }
 0x128   : > { %vm1399_vm8 = vcmp.ge.f32.partialorder %v888_v6, 0.0  ;;  %v1527_v9 = vmul.f32 0.2, %v888_v6  ;;  %vm1463_vm9 = vcmp.ge.f32.partialorder %v1208_v7, 0.0  ;;  %v1656_v10 = vsel %vm1400_vm6, %v2259_v2, %v1528_v5 }
 0x129   : > { %v1591_v11 = vmul.f32 0.2, %v1208_v7  ;;  %1785 = vst.msk [vmem:[%s2723_s22 + $0x108] sm:$0xff] %vm1751_vm1, %v1656_v10  ;;  %v1720_v12 = vsel %vm1464_vm7, %v2355_v3, %v1592_v8  ;;  %v2262_v14 = vpop.f32.mrb[34].mxu0 }
 0x12a   : > { %v1655_v13 = vsel %vm1399_vm8, %v888_v6, %v1527_v9  ;;  %v2358_v15 = vpop.f32.mrb[34].mxu1  ;;  %1849 = vst.msk [vmem:[%s2723_s22 + $0x308] sm:$0xff] %vm1751_vm1, %v1720_v12  ;;  %vm1402_vm10 = vcmp.ge.f32.partialorder %v2262_v14, 0.0  ;;  %v1530_v17 = vmul.f32 0.2, %v2262_v14  ;;  %v898_v18 = vpop.f32.mrb[35].mxu0 }
 0x12b   : > { %1784 = vst.msk [vmem:[%s2723_s22 + $0x100] sm:$0xff] %vm1751_vm1, %v1655_v13  ;;  %v1719_v16 = vsel %vm1463_vm9, %v1208_v7, %v1591_v11  ;;  %vm1466_vm11 = vcmp.ge.f32.partialorder %v2358_v15, 0.0  ;;  %v1218_v19 = vpop.f32.mrb[35].mxu1  ;;  %v1594_v20 = vmul.f32 0.2, %v2358_v15  ;;  %vm1401_vm12 = vcmp.ge.f32.partialorder %v898_v18, 0.0 }
 0x12c   : > { %1848 = vst.msk [vmem:[%s2723_s22 + $0x300] sm:$0xff] %vm1751_vm1, %v1719_v16  ;;  %v1529_v21 = vmul.f32 0.2, %v898_v18  ;;  %vm1465_vm13 = vcmp.ge.f32.partialorder %v1218_v19, 0.0  ;;  %v1658_v22 = vsel %vm1402_vm10, %v2262_v14, %v1530_v17  ;;  %v1593_v23 = vmul.f32 0.2, %v1218_v19 }
 0x12d   : > { %1787 = vst.msk [vmem:[%s2723_s22 + $0x118] sm:$0xff] %vm1751_vm1, %v1658_v22  ;;  %v1722_v24 = vsel %vm1466_vm11, %v2358_v15, %v1594_v20  ;;  %v2265_v26 = vpop.f32.mrb[36].mxu0 }
 0x12e   : > { %v1657_v25 = vsel %vm1401_vm12, %v898_v18, %v1529_v21  ;;  %v2361_v27 = vpop.f32.mrb[36].mxu1  ;;  %1851 = vst.msk [vmem:[%s2723_s22 + $0x318] sm:$0xff] %vm1751_vm1, %v1722_v24  ;;  %v1721_v28 = vsel %vm1465_vm13, %v1218_v19, %v1593_v23  ;;  %vm1404_vm14 = vcmp.ge.f32.partialorder %v2265_v26, 0.0  ;;  %v1532_v29 = vmul.f32 0.2, %v2265_v26  ;;  %v908_v30 = vpop.f32.mrb[37].mxu0 }
 0x12f   : > { %1786 = vst.msk [vmem:[%s2723_s22 + $0x110] sm:$0xff] %vm1751_vm1, %v1657_v25  ;;  %vm1468_vm15 = vcmp.ge.f32.partialorder %v2361_v27, 0.0  ;;  %v1228_v31 = vpop.f32.mrb[37].mxu1  ;;  %1850 = vst.msk [vmem:[%s2723_s22 + $0x310] sm:$0xff] %vm1751_vm1, %v1721_v28  ;;  %v1596_v32 = vmul.f32 0.2, %v2361_v27 }
 0x130   : > { %vm1403_vm0 = vcmp.ge.f32.partialorder %v908_v30, 0.0  ;;  %v1531_v33 = vmul.f32 0.2, %v908_v30  ;;  %vm1467_vm2 = vcmp.ge.f32.partialorder %v1228_v31, 0.0  ;;  %v1660_v34 = vsel %vm1404_vm14, %v2265_v26, %v1532_v29 }
 0x131   : > { %v1595_v35 = vmul.f32 0.2, %v1228_v31  ;;  %1789 = vst.msk [vmem:[%s2723_s22 + $0x128] sm:$0xff] %vm1751_vm1, %v1660_v34  ;;  %v1724_v36 = vsel %vm1468_vm15, %v2361_v27, %v1596_v32  ;;  %v2268_v38 = vpop.f32.mrb[38].mxu0 }
 0x132   : > { %v1659_v37 = vsel %vm1403_vm0, %v908_v30, %v1531_v33  ;;  %v2364_v39 = vpop.f32.mrb[38].mxu1  ;;  %1853 = vst.msk [vmem:[%s2723_s22 + $0x328] sm:$0xff] %vm1751_vm1, %v1724_v36  ;;  %vm1406_vm3 = vcmp.ge.f32.partialorder %v2268_v38, 0.0  ;;  %v1534_v41 = vmul.f32 0.2, %v2268_v38  ;;  %v918_v42 = vpop.f32.mrb[39].mxu0 }
 0x133   : > { %1788 = vst.msk [vmem:[%s2723_s22 + $0x120] sm:$0xff] %vm1751_vm1, %v1659_v37  ;;  %v1723_v40 = vsel %vm1467_vm2, %v1228_v31, %v1595_v35  ;;  %vm1470_vm4 = vcmp.ge.f32.partialorder %v2364_v39, 0.0  ;;  %v1238_v43 = vpop.f32.mrb[39].mxu1  ;;  %v1598_v44 = vmul.f32 0.2, %v2364_v39  ;;  %vm1405_vm5 = vcmp.ge.f32.partialorder %v918_v42, 0.0 }
 0x134   : > { %1852 = vst.msk [vmem:[%s2723_s22 + $0x320] sm:$0xff] %vm1751_vm1, %v1723_v40  ;;  %v1533_v45 = vmul.f32 0.2, %v918_v42  ;;  %vm1469_vm6 = vcmp.ge.f32.partialorder %v1238_v43, 0.0  ;;  %v1662_v46 = vsel %vm1406_vm3, %v2268_v38, %v1534_v41  ;;  %v1597_v47 = vmul.f32 0.2, %v1238_v43 }
 0x135   : > { %1791 = vst.msk [vmem:[%s2723_s22 + $0x138] sm:$0xff] %vm1751_vm1, %v1662_v46  ;;  %v1726_v48 = vsel %vm1470_vm4, %v2364_v39, %v1598_v44  ;;  %v2271_v50 = vpop.f32.mrb[40].mxu0 }
 0x136   : > { %v1661_v49 = vsel %vm1405_vm5, %v918_v42, %v1533_v45  ;;  %v2367_v51 = vpop.f32.mrb[40].mxu1  ;;  %1855 = vst.msk [vmem:[%s2723_s22 + $0x338] sm:$0xff] %vm1751_vm1, %v1726_v48  ;;  %v1725_v52 = vsel %vm1469_vm6, %v1238_v43, %v1597_v47  ;;  %vm1408_vm7 = vcmp.ge.f32.partialorder %v2271_v50, 0.0  ;;  %v1536_v53 = vmul.f32 0.2, %v2271_v50  ;;  %v928_v54 = vpop.f32.mrb[41].mxu0 }
 0x137   : > { %1790 = vst.msk [vmem:[%s2723_s22 + $0x130] sm:$0xff] %vm1751_vm1, %v1661_v49  ;;  %vm1472_vm8 = vcmp.ge.f32.partialorder %v2367_v51, 0.0  ;;  %v1248_v55 = vpop.f32.mrb[41].mxu1  ;;  %1854 = vst.msk [vmem:[%s2723_s22 + $0x330] sm:$0xff] %vm1751_vm1, %v1725_v52  ;;  %v1600_v56 = vmul.f32 0.2, %v2367_v51 }
 0x138   : > { %vm1407_vm9 = vcmp.ge.f32.partialorder %v928_v54, 0.0  ;;  %v1535_v57 = vmul.f32 0.2, %v928_v54  ;;  %vm1471_vm10 = vcmp.ge.f32.partialorder %v1248_v55, 0.0  ;;  %v1664_v58 = vsel %vm1408_vm7, %v2271_v50, %v1536_v53 }
 0x139   : > { %v1599_v59 = vmul.f32 0.2, %v1248_v55  ;;  %1793 = vst.msk [vmem:[%s2723_s22 + $0x148] sm:$0xff] %vm1751_vm1, %v1664_v58  ;;  %v1728_v60 = vsel %vm1472_vm8, %v2367_v51, %v1600_v56  ;;  %v2274_v62 = vpop.f32.mrb[42].mxu0 }
 0x13a   : > { %v1663_v61 = vsel %vm1407_vm9, %v928_v54, %v1535_v57  ;;  %v2370_v63 = vpop.f32.mrb[42].mxu1  ;;  %1857 = vst.msk [vmem:[%s2723_s22 + $0x348] sm:$0xff] %vm1751_vm1, %v1728_v60  ;;  %vm1410_vm11 = vcmp.ge.f32.partialorder %v2274_v62, 0.0  ;;  %v1538_v1 = vmul.f32 0.2, %v2274_v62  ;;  %v938_v2 = vpop.f32.mrb[43].mxu0 }
 0x13b   : > { %1792 = vst.msk [vmem:[%s2723_s22 + $0x140] sm:$0xff] %vm1751_vm1, %v1663_v61  ;;  %v1727_v0 = vsel %vm1471_vm10, %v1248_v55, %v1599_v59  ;;  %vm1474_vm12 = vcmp.ge.f32.partialorder %v2370_v63, 0.0  ;;  %v1258_v3 = vpop.f32.mrb[43].mxu1  ;;  %v1602_v4 = vmul.f32 0.2, %v2370_v63  ;;  %vm1409_vm13 = vcmp.ge.f32.partialorder %v938_v2, 0.0 }
 0x13c   : > { %1856 = vst.msk [vmem:[%s2723_s22 + $0x340] sm:$0xff] %vm1751_vm1, %v1727_v0  ;;  %v1537_v5 = vmul.f32 0.2, %v938_v2  ;;  %vm1473_vm14 = vcmp.ge.f32.partialorder %v1258_v3, 0.0  ;;  %v1666_v6 = vsel %vm1410_vm11, %v2274_v62, %v1538_v1  ;;  %v1601_v7 = vmul.f32 0.2, %v1258_v3 }
 0x13d   : > { %1795 = vst.msk [vmem:[%s2723_s22 + $0x158] sm:$0xff] %vm1751_vm1, %v1666_v6  ;;  %v1730_v8 = vsel %vm1474_vm12, %v2370_v63, %v1602_v4  ;;  %v2277_v10 = vpop.f32.mrb[44].mxu0 }
 0x13e   : > { %v1665_v9 = vsel %vm1409_vm13, %v938_v2, %v1537_v5  ;;  %v2373_v11 = vpop.f32.mrb[44].mxu1  ;;  %1859 = vst.msk [vmem:[%s2723_s22 + $0x358] sm:$0xff] %vm1751_vm1, %v1730_v8  ;;  %v1729_v12 = vsel %vm1473_vm14, %v1258_v3, %v1601_v7  ;;  %vm1412_vm15 = vcmp.ge.f32.partialorder %v2277_v10, 0.0  ;;  %v1540_v13 = vmul.f32 0.2, %v2277_v10  ;;  %v948_v14 = vpop.f32.mrb[45].mxu0 }
 0x13f   : > { %1794 = vst.msk [vmem:[%s2723_s22 + $0x150] sm:$0xff] %vm1751_vm1, %v1665_v9  ;;  %vm1476_vm0 = vcmp.ge.f32.partialorder %v2373_v11, 0.0  ;;  %v1268_v15 = vpop.f32.mrb[45].mxu1  ;;  %1858 = vst.msk [vmem:[%s2723_s22 + $0x350] sm:$0xff] %vm1751_vm1, %v1729_v12  ;;  %v1604_v16 = vmul.f32 0.2, %v2373_v11 }
 0x140   : > { %vm1411_vm2 = vcmp.ge.f32.partialorder %v948_v14, 0.0  ;;  %v1539_v17 = vmul.f32 0.2, %v948_v14  ;;  %vm1475_vm3 = vcmp.ge.f32.partialorder %v1268_v15, 0.0  ;;  %v1668_v18 = vsel %vm1412_vm15, %v2277_v10, %v1540_v13 }
 0x141   : > { %v1603_v19 = vmul.f32 0.2, %v1268_v15  ;;  %1797 = vst.msk [vmem:[%s2723_s22 + $0x168] sm:$0xff] %vm1751_vm1, %v1668_v18  ;;  %v1732_v20 = vsel %vm1476_vm0, %v2373_v11, %v1604_v16  ;;  %v2280_v22 = vpop.f32.mrb[46].mxu0 }
 0x142   : > { %v1667_v21 = vsel %vm1411_vm2, %v948_v14, %v1539_v17  ;;  %v2376_v23 = vpop.f32.mrb[46].mxu1  ;;  %1861 = vst.msk [vmem:[%s2723_s22 + $0x368] sm:$0xff] %vm1751_vm1, %v1732_v20  ;;  %vm1414_vm4 = vcmp.ge.f32.partialorder %v2280_v22, 0.0  ;;  %v1542_v25 = vmul.f32 0.2, %v2280_v22  ;;  %v958_v26 = vpop.f32.mrb[47].mxu0 }
 0x143   : > { %1796 = vst.msk [vmem:[%s2723_s22 + $0x160] sm:$0xff] %vm1751_vm1, %v1667_v21  ;;  %v1731_v24 = vsel %vm1475_vm3, %v1268_v15, %v1603_v19  ;;  %vm1478_vm5 = vcmp.ge.f32.partialorder %v2376_v23, 0.0  ;;  %v1278_v27 = vpop.f32.mrb[47].mxu1  ;;  %v1606_v28 = vmul.f32 0.2, %v2376_v23  ;;  %vm1413_vm6 = vcmp.ge.f32.partialorder %v958_v26, 0.0 }
 0x144   : > { %1860 = vst.msk [vmem:[%s2723_s22 + $0x360] sm:$0xff] %vm1751_vm1, %v1731_v24  ;;  %v1541_v29 = vmul.f32 0.2, %v958_v26  ;;  %vm1477_vm7 = vcmp.ge.f32.partialorder %v1278_v27, 0.0  ;;  %v1670_v30 = vsel %vm1414_vm4, %v2280_v22, %v1542_v25  ;;  %v1605_v31 = vmul.f32 0.2, %v1278_v27 }
 0x145   : > { %1799 = vst.msk [vmem:[%s2723_s22 + $0x178] sm:$0xff] %vm1751_vm1, %v1670_v30  ;;  %v1734_v32 = vsel %vm1478_vm5, %v2376_v23, %v1606_v28  ;;  %v2283_v34 = vpop.f32.mrb[48].mxu0 }
 0x146   : > { %v1669_v33 = vsel %vm1413_vm6, %v958_v26, %v1541_v29  ;;  %v2379_v35 = vpop.f32.mrb[48].mxu1  ;;  %1863 = vst.msk [vmem:[%s2723_s22 + $0x378] sm:$0xff] %vm1751_vm1, %v1734_v32  ;;  %v1733_v36 = vsel %vm1477_vm7, %v1278_v27, %v1605_v31  ;;  %vm1416_vm8 = vcmp.ge.f32.partialorder %v2283_v34, 0.0  ;;  %v1544_v37 = vmul.f32 0.2, %v2283_v34  ;;  %v968_v38 = vpop.f32.mrb[49].mxu0 }
 0x147   : > { %1798 = vst.msk [vmem:[%s2723_s22 + $0x170] sm:$0xff] %vm1751_vm1, %v1669_v33  ;;  %vm1480_vm9 = vcmp.ge.f32.partialorder %v2379_v35, 0.0  ;;  %v1288_v39 = vpop.f32.mrb[49].mxu1  ;;  %1862 = vst.msk [vmem:[%s2723_s22 + $0x370] sm:$0xff] %vm1751_vm1, %v1733_v36  ;;  %v1608_v40 = vmul.f32 0.2, %v2379_v35 }
 0x148   : > { %vm1415_vm10 = vcmp.ge.f32.partialorder %v968_v38, 0.0  ;;  %v1543_v41 = vmul.f32 0.2, %v968_v38  ;;  %vm1479_vm11 = vcmp.ge.f32.partialorder %v1288_v39, 0.0  ;;  %v1672_v42 = vsel %vm1416_vm8, %v2283_v34, %v1544_v37 }
 0x149   : > { %v1607_v43 = vmul.f32 0.2, %v1288_v39  ;;  %1801 = vst.msk [vmem:[%s2723_s22 + $0x188] sm:$0xff] %vm1751_vm1, %v1672_v42  ;;  %v1736_v44 = vsel %vm1480_vm9, %v2379_v35, %v1608_v40  ;;  %v2286_v46 = vpop.f32.mrb[50].mxu0 }
 0x14a   : > { %v1671_v45 = vsel %vm1415_vm10, %v968_v38, %v1543_v41  ;;  %v2382_v47 = vpop.f32.mrb[50].mxu1  ;;  %1865 = vst.msk [vmem:[%s2723_s22 + $0x388] sm:$0xff] %vm1751_vm1, %v1736_v44  ;;  %vm1418_vm12 = vcmp.ge.f32.partialorder %v2286_v46, 0.0  ;;  %v1546_v49 = vmul.f32 0.2, %v2286_v46  ;;  %v978_v50 = vpop.f32.mrb[51].mxu0 }
 0x14b   : > { %1800 = vst.msk [vmem:[%s2723_s22 + $0x180] sm:$0xff] %vm1751_vm1, %v1671_v45  ;;  %v1735_v48 = vsel %vm1479_vm11, %v1288_v39, %v1607_v43  ;;  %vm1482_vm13 = vcmp.ge.f32.partialorder %v2382_v47, 0.0  ;;  %v1298_v51 = vpop.f32.mrb[51].mxu1  ;;  %v1610_v52 = vmul.f32 0.2, %v2382_v47  ;;  %vm1417_vm14 = vcmp.ge.f32.partialorder %v978_v50, 0.0 }
 0x14c   : > { %1864 = vst.msk [vmem:[%s2723_s22 + $0x380] sm:$0xff] %vm1751_vm1, %v1735_v48  ;;  %v1545_v53 = vmul.f32 0.2, %v978_v50  ;;  %vm1481_vm15 = vcmp.ge.f32.partialorder %v1298_v51, 0.0  ;;  %v1674_v54 = vsel %vm1418_vm12, %v2286_v46, %v1546_v49  ;;  %v1609_v55 = vmul.f32 0.2, %v1298_v51 }
 0x14d   : > { %1803 = vst.msk [vmem:[%s2723_s22 + $0x198] sm:$0xff] %vm1751_vm1, %v1674_v54  ;;  %v1738_v56 = vsel %vm1482_vm13, %v2382_v47, %v1610_v52  ;;  %v2289_v58 = vpop.f32.mrb[52].mxu0 }
 0x14e   : > { %v1673_v57 = vsel %vm1417_vm14, %v978_v50, %v1545_v53  ;;  %v2385_v59 = vpop.f32.mrb[52].mxu1  ;;  %1867 = vst.msk [vmem:[%s2723_s22 + $0x398] sm:$0xff] %vm1751_vm1, %v1738_v56  ;;  %v1737_v60 = vsel %vm1481_vm15, %v1298_v51, %v1609_v55  ;;  %vm1420_vm0 = vcmp.ge.f32.partialorder %v2289_v58, 0.0  ;;  %v1548_v61 = vmul.f32 0.2, %v2289_v58  ;;  %v988_v62 = vpop.f32.mrb[53].mxu0 }
 0x14f   : > { %1802 = vst.msk [vmem:[%s2723_s22 + $0x190] sm:$0xff] %vm1751_vm1, %v1673_v57  ;;  %vm1484_vm2 = vcmp.ge.f32.partialorder %v2385_v59, 0.0  ;;  %v1308_v63 = vpop.f32.mrb[53].mxu1  ;;  %1866 = vst.msk [vmem:[%s2723_s22 + $0x390] sm:$0xff] %vm1751_vm1, %v1737_v60  ;;  %v1612_v0 = vmul.f32 0.2, %v2385_v59 }
 0x150   : > { %vm1419_vm3 = vcmp.ge.f32.partialorder %v988_v62, 0.0  ;;  %v1547_v1 = vmul.f32 0.2, %v988_v62  ;;  %vm1483_vm4 = vcmp.ge.f32.partialorder %v1308_v63, 0.0  ;;  %v1676_v2 = vsel %vm1420_vm0, %v2289_v58, %v1548_v61 }
 0x151   : > { %v1611_v3 = vmul.f32 0.2, %v1308_v63  ;;  %1805 = vst.msk [vmem:[%s2723_s22 + $0x1a8] sm:$0xff] %vm1751_vm1, %v1676_v2  ;;  %v1740_v4 = vsel %vm1484_vm2, %v2385_v59, %v1612_v0  ;;  %v2292_v6 = vpop.f32.mrb[54].mxu0 }
 0x152   : > { %v1675_v5 = vsel %vm1419_vm3, %v988_v62, %v1547_v1  ;;  %v2388_v7 = vpop.f32.mrb[54].mxu1  ;;  %1869 = vst.msk [vmem:[%s2723_s22 + $0x3a8] sm:$0xff] %vm1751_vm1, %v1740_v4  ;;  %vm1422_vm5 = vcmp.ge.f32.partialorder %v2292_v6, 0.0  ;;  %v1550_v9 = vmul.f32 0.2, %v2292_v6  ;;  %v998_v10 = vpop.f32.mrb[55].mxu0 }
 0x153   : > { %1804 = vst.msk [vmem:[%s2723_s22 + $0x1a0] sm:$0xff] %vm1751_vm1, %v1675_v5  ;;  %v1739_v8 = vsel %vm1483_vm4, %v1308_v63, %v1611_v3  ;;  %vm1486_vm6 = vcmp.ge.f32.partialorder %v2388_v7, 0.0  ;;  %v1318_v11 = vpop.f32.mrb[55].mxu1  ;;  %v1614_v12 = vmul.f32 0.2, %v2388_v7  ;;  %vm1421_vm7 = vcmp.ge.f32.partialorder %v998_v10, 0.0 }
 0x154   : > { %1868 = vst.msk [vmem:[%s2723_s22 + $0x3a0] sm:$0xff] %vm1751_vm1, %v1739_v8  ;;  %v1549_v13 = vmul.f32 0.2, %v998_v10  ;;  %vm1485_vm8 = vcmp.ge.f32.partialorder %v1318_v11, 0.0  ;;  %v1678_v14 = vsel %vm1422_vm5, %v2292_v6, %v1550_v9  ;;  %v1613_v15 = vmul.f32 0.2, %v1318_v11 }
 0x155   : > { %1807 = vst.msk [vmem:[%s2723_s22 + $0x1b8] sm:$0xff] %vm1751_vm1, %v1678_v14  ;;  %v1742_v16 = vsel %vm1486_vm6, %v2388_v7, %v1614_v12  ;;  %v2295_v18 = vpop.f32.mrb[56].mxu0 }
 0x156   : > { %v1677_v17 = vsel %vm1421_vm7, %v998_v10, %v1549_v13  ;;  %v2391_v19 = vpop.f32.mrb[56].mxu1  ;;  %1871 = vst.msk [vmem:[%s2723_s22 + $0x3b8] sm:$0xff] %vm1751_vm1, %v1742_v16  ;;  %v1741_v20 = vsel %vm1485_vm8, %v1318_v11, %v1613_v15  ;;  %vm1424_vm9 = vcmp.ge.f32.partialorder %v2295_v18, 0.0  ;;  %v1552_v21 = vmul.f32 0.2, %v2295_v18  ;;  %v1008_v22 = vpop.f32.mrb[57].mxu0 }
 0x157   : > { %1806 = vst.msk [vmem:[%s2723_s22 + $0x1b0] sm:$0xff] %vm1751_vm1, %v1677_v17  ;;  %vm1488_vm10 = vcmp.ge.f32.partialorder %v2391_v19, 0.0  ;;  %v1328_v23 = vpop.f32.mrb[57].mxu1  ;;  %1870 = vst.msk [vmem:[%s2723_s22 + $0x3b0] sm:$0xff] %vm1751_vm1, %v1741_v20  ;;  %v1616_v24 = vmul.f32 0.2, %v2391_v19 }
 0x158   : > { %vm1423_vm11 = vcmp.ge.f32.partialorder %v1008_v22, 0.0  ;;  %v1551_v25 = vmul.f32 0.2, %v1008_v22  ;;  %vm1487_vm12 = vcmp.ge.f32.partialorder %v1328_v23, 0.0  ;;  %v1680_v26 = vsel %vm1424_vm9, %v2295_v18, %v1552_v21 }
 0x159   : > { %v1615_v27 = vmul.f32 0.2, %v1328_v23  ;;  %1809 = vst.msk [vmem:[%s2723_s22 + $0x1c8] sm:$0xff] %vm1751_vm1, %v1680_v26  ;;  %v1744_v28 = vsel %vm1488_vm10, %v2391_v19, %v1616_v24  ;;  %v2298_v30 = vpop.f32.mrb[58].mxu0 }
 0x15a   : > { %v1679_v29 = vsel %vm1423_vm11, %v1008_v22, %v1551_v25  ;;  %v2394_v31 = vpop.f32.mrb[58].mxu1  ;;  %1873 = vst.msk [vmem:[%s2723_s22 + $0x3c8] sm:$0xff] %vm1751_vm1, %v1744_v28  ;;  %vm1426_vm13 = vcmp.ge.f32.partialorder %v2298_v30, 0.0  ;;  %v1554_v33 = vmul.f32 0.2, %v2298_v30  ;;  %v1018_v34 = vpop.f32.mrb[59].mxu0 }
 0x15b   : > { %1808 = vst.msk [vmem:[%s2723_s22 + $0x1c0] sm:$0xff] %vm1751_vm1, %v1679_v29  ;;  %v1743_v32 = vsel %vm1487_vm12, %v1328_v23, %v1615_v27  ;;  %vm1490_vm14 = vcmp.ge.f32.partialorder %v2394_v31, 0.0  ;;  %v1338_v35 = vpop.f32.mrb[59].mxu1  ;;  %v1618_v36 = vmul.f32 0.2, %v2394_v31  ;;  %vm1425_vm15 = vcmp.ge.f32.partialorder %v1018_v34, 0.0 }
 0x15c   : > { %1872 = vst.msk [vmem:[%s2723_s22 + $0x3c0] sm:$0xff] %vm1751_vm1, %v1743_v32  ;;  %v1553_v37 = vmul.f32 0.2, %v1018_v34  ;;  %vm1489_vm0 = vcmp.ge.f32.partialorder %v1338_v35, 0.0  ;;  %v1682_v38 = vsel %vm1426_vm13, %v2298_v30, %v1554_v33  ;;  %v1617_v39 = vmul.f32 0.2, %v1338_v35 }
 0x15d   : > { %1811 = vst.msk [vmem:[%s2723_s22 + $0x1d8] sm:$0xff] %vm1751_vm1, %v1682_v38  ;;  %v1746_v40 = vsel %vm1490_vm14, %v2394_v31, %v1618_v36  ;;  %v2301_v42 = vpop.f32.mrb[60].mxu0 }
 0x15e   : > { %v1681_v41 = vsel %vm1425_vm15, %v1018_v34, %v1553_v37  ;;  %v2397_v43 = vpop.f32.mrb[60].mxu1  ;;  %1875 = vst.msk [vmem:[%s2723_s22 + $0x3d8] sm:$0xff] %vm1751_vm1, %v1746_v40  ;;  %v1745_v44 = vsel %vm1489_vm0, %v1338_v35, %v1617_v39  ;;  %vm1428_vm2 = vcmp.ge.f32.partialorder %v2301_v42, 0.0  ;;  %v1556_v45 = vmul.f32 0.2, %v2301_v42  ;;  %v1028_v46 = vpop.f32.mrb[61].mxu0 }
 0x15f   : > { %1810 = vst.msk [vmem:[%s2723_s22 + $0x1d0] sm:$0xff] %vm1751_vm1, %v1681_v41  ;;  %vm1492_vm3 = vcmp.ge.f32.partialorder %v2397_v43, 0.0  ;;  %v1348_v47 = vpop.f32.mrb[61].mxu1  ;;  %1874 = vst.msk [vmem:[%s2723_s22 + $0x3d0] sm:$0xff] %vm1751_vm1, %v1745_v44  ;;  %v1620_v48 = vmul.f32 0.2, %v2397_v43 }
 0x160   : > { %vm1427_vm4 = vcmp.ge.f32.partialorder %v1028_v46, 0.0  ;;  %v1555_v49 = vmul.f32 0.2, %v1028_v46  ;;  %vm1491_vm5 = vcmp.ge.f32.partialorder %v1348_v47, 0.0  ;;  %v1684_v50 = vsel %vm1428_vm2, %v2301_v42, %v1556_v45 }
 0x161   : > { %v1619_v51 = vmul.f32 0.2, %v1348_v47  ;;  %1813 = vst.msk [vmem:[%s2723_s22 + $0x1e8] sm:$0xff] %vm1751_vm1, %v1684_v50  ;;  %v1748_v52 = vsel %vm1492_vm3, %v2397_v43, %v1620_v48  ;;  %v2304_v54 = vpop.f32.mrb[62].mxu0 }
 0x162   : > { %v1683_v53 = vsel %vm1427_vm4, %v1028_v46, %v1555_v49  ;;  %v2400_v55 = vpop.f32.mrb[62].mxu1  ;;  %1877 = vst.msk [vmem:[%s2723_s22 + $0x3e8] sm:$0xff] %vm1751_vm1, %v1748_v52  ;;  %vm1430_vm6 = vcmp.ge.f32.partialorder %v2304_v54, 0.0  ;;  %v1558_v57 = vmul.f32 0.2, %v2304_v54  ;;  %v1038_v58 = vpop.f32.mrb[63].mxu0 }
 0x163   : > { %1812 = vst.msk [vmem:[%s2723_s22 + $0x1e0] sm:$0xff] %vm1751_vm1, %v1683_v53  ;;  %v1747_v56 = vsel %vm1491_vm5, %v1348_v47, %v1619_v51  ;;  %vm1494_vm7 = vcmp.ge.f32.partialorder %v2400_v55, 0.0  ;;  %v1358_v59 = vpop.f32.mrb[63].mxu1  ;;  %v1622_v60 = vmul.f32 0.2, %v2400_v55  ;;  %vm1429_vm8 = vcmp.ge.f32.partialorder %v1038_v58, 0.0 }
 0x164   : > { %1876 = vst.msk [vmem:[%s2723_s22 + $0x3e0] sm:$0xff] %vm1751_vm1, %v1747_v56  ;;  %v1557_v61 = vmul.f32 0.2, %v1038_v58  ;;  %vm1493_vm9 = vcmp.ge.f32.partialorder %v1358_v59, 0.0  ;;  %v1686_v62 = vsel %vm1430_vm6, %v2304_v54, %v1558_v57  ;;  %v1621_v63 = vmul.f32 0.2, %v1358_v59 }
 0x165   : > { %1815 = vst.msk [vmem:[%s2723_s22 + $0x1f8] sm:$0xff] %vm1751_vm1, %v1686_v62  ;;  %v1750_v0 = vsel %vm1494_vm7, %v2400_v55, %v1622_v60 }
 0x166   : > { %v1685_v1 = vsel %vm1429_vm8, %v1038_v58, %v1557_v61  ;;  %1879 = vst.msk [vmem:[%s2723_s22 + $0x3f8] sm:$0xff] %vm1751_vm1, %v1750_v0  ;;  %v1749_v2 = vsel %vm1493_vm9, %v1358_v59, %v1621_v63 }
 0x167   : > { %1814 = vst.msk [vmem:[%s2723_s22 + $0x1f0] sm:$0xff] %vm1751_vm1, %v1685_v1  ;;  %1878 = vst.msk [vmem:[%s2723_s22 + $0x3f0] sm:$0xff] %vm1751_vm1, %v1749_v2 }
 0x168 PF: > { %s12_s9 = sadd.s32 1, %s2421_s9  }
 0x169   : > { %p9_p4 = scmp.ge.s32.totalorder %s12_s9, 4  }
 0x16b   :  { %11 = sbr.rel (!%p9_p4) target bundleno = 1 (0x1), region = 58 }

</bundles_post_ra>
